<compile_context>
chip_gen: v6e
topology: v6e:2x2x1
jax: 0.10.0
libtpu: 0.0.40
codegen_flags: <defaults>
</compile_context>

<pallas_src>
import functools

import jax
import jax.numpy as jnp
from jax import lax
from jax.experimental import pallas as pl
from jax.experimental.pallas import tpu as pltpu

_LN_EPS = 1e-5  # torch.nn.LayerNorm default


def _erf(x):
    # Exact-GELU erf (torch nn.GELU approximate='none') via Abramowitz-Stegun
    # 7.1.26 (|abs err| < 1.5e-7 ~= f32 eps); lowers with only exp/mul/add.
    p = 0.3275911
    a1, a2, a3, a4, a5 = (0.254829592, -0.284496736, 1.421413741,
                          -1.453152027, 1.061405429)
    s = jnp.where(x >= 0.0, 1.0, -1.0)
    ax = jnp.abs(x)
    t = 1.0 / (1.0 + p * ax)
    poly = t * (a1 + t * (a2 + t * (a3 + t * (a4 + t * a5))))
    return s * (1.0 - poly * jnp.exp(-ax * ax))


def _gelu_exact(x):
    return 0.5 * x * (1.0 + _erf(x * 0.7071067811865476))


def _layernorm(x, gamma, beta):
    # torch LayerNorm: biased variance over last dim, eps inside the sqrt.
    mu = jnp.mean(x, axis=-1, keepdims=True)
    var = jnp.mean((x - mu) ** 2, axis=-1, keepdims=True)
    return (x - mu) * lax.rsqrt(var + _LN_EPS) * gamma + beta


# --------------------------- fused all-layers kernel --------------------------


def _fused_layer_kernel(x_ref, ln1g_ref, ln1b_ref, wq_ref, wk_ref, wv_ref,
                        wout_ref, bout_ref, ln2g_ref, ln2b_ref,
                        w1_ref, b1_ref, w2_ref, b2_ref, o_ref, *, heads):
    f32 = jnp.float32
    bf16 = jnp.bfloat16
    l = pl.program_id(1)

    # Layer 0: seed the resident activation slab (o_ref stays in VMEM across the
    # whole depth axis since its block index ignores l); later layers RMW it.
    @pl.when(l == 0)
    def _():
        o_ref[0] = x_ref[0]

    x = o_ref[0]                                            # (N, D) f32

    # ---- attention residual block: x = x + to_out(softmax(qk^T) v) ----------
    xn = _layernorm(x, ln1g_ref[0], ln1b_ref[0]).astype(bf16)
    wq = wq_ref[0]                                          # (heads, D, dh) bf16
    wk = wk_ref[0]
    wv = wv_ref[0]

    outs = []
    for h in range(heads):
        # Per-head weights are major-axis slices (no lane-misaligned slicing of
        # a wide qkv activation); each matmul contracts over the full K=D.
        # scale (dim ** -0.5) is pre-folded into wq (to_qkv has no bias).
        q_h = jnp.dot(xn, wq[h], preferred_element_type=f32)   # (N, dh)
        k_h = jnp.dot(xn, wk[h], preferred_element_type=f32)
        v_h = jnp.dot(xn, wv[h], preferred_element_type=f32)
        dots = lax.dot_general(q_h.astype(bf16), k_h.astype(bf16),
                               (((1,), (1,)), ((), ())),
                               preferred_element_type=f32)      # (N, N)
        dots = dots - jnp.max(dots, axis=-1, keepdims=True)
        e = jnp.exp(dots)
        p = e * pl.reciprocal(jnp.sum(e, axis=-1, keepdims=True), approx=True)
        outs.append(jnp.dot(p.astype(bf16), v_h.astype(bf16),
                            preferred_element_type=f32))        # (N, dh) f32

    # One full-K output projection instead of `heads` K=dh matmuls + VPU adds.
    attn_cat = jnp.concatenate(outs, axis=-1).astype(bf16)      # (N, D)
    attn_out = jnp.dot(attn_cat, wout_ref[0], preferred_element_type=f32)
    x = x + attn_out + bout_ref[0]                              # residual + bias

    # ---- feed-forward residual block: x = x + W2 gelu(W1 ln(x) + b1) + b2 ---
    xn2 = _layernorm(x, ln2g_ref[0], ln2b_ref[0]).astype(bf16)
    hmid = jnp.dot(xn2, w1_ref[0], preferred_element_type=f32) + b1_ref[0]
    hmid = _gelu_exact(hmid)
    y = jnp.dot(hmid.astype(bf16), w2_ref[0], preferred_element_type=f32) + b2_ref[0]
    o_ref[0] = (x + y).astype(o_ref.dtype)                      # residual


# ------------------------------ pallas wrapper --------------------------------


def transformer_forward(x, p, *, heads):
    B, N, D = x.shape
    depth, H, _, dh = p["wq"].shape
    M = p["w1"].shape[2]
    assert H == heads and heads * dh == D

    kernel = functools.partial(_fused_layer_kernel, heads=heads)
    xmap = lambda b, l: (b, 0, 0)            # activation: per-b, resident over l
    w3 = lambda b, l: (l, 0, 0)              # per-layer weight/bias (3-D)
    w4 = lambda b, l: (l, 0, 0, 0)           # per-layer per-head weights (4-D)

    return pl.pallas_call(
        kernel,
        out_shape=jax.ShapeDtypeStruct((B, N, D), x.dtype),
        grid=(B, depth),
        in_specs=[
            pl.BlockSpec((1, N, D), xmap),          # x (read only at l == 0)
            pl.BlockSpec((1, 1, D), w3),            # ln1 gamma
            pl.BlockSpec((1, 1, D), w3),            # ln1 beta
            pl.BlockSpec((1, heads, D, dh), w4),    # wq (bf16, scale folded)
            pl.BlockSpec((1, heads, D, dh), w4),    # wk (bf16)
            pl.BlockSpec((1, heads, D, dh), w4),    # wv (bf16)
            pl.BlockSpec((1, D, D), w3),            # wout (bf16)
            pl.BlockSpec((1, 1, D), w3),            # bout
            pl.BlockSpec((1, 1, D), w3),            # ln2 gamma
            pl.BlockSpec((1, 1, D), w3),            # ln2 beta
            pl.BlockSpec((1, D, M), w3),            # w1 (bf16)
            pl.BlockSpec((1, 1, M), w3),            # b1
            pl.BlockSpec((1, M, D), w3),            # w2 (bf16)
            pl.BlockSpec((1, 1, D), w3),            # b2
        ],
        out_specs=pl.BlockSpec((1, N, D), xmap),
        compiler_params=pltpu.CompilerParams(
            dimension_semantics=("parallel", "arbitrary"),
            vmem_limit_bytes=40 * 1024 * 1024),
    )(x, p["ln1_g"], p["ln1_b"], p["wq"], p["wk"], p["wv"], p["wout"],
      p["bout"], p["ln2_g"], p["ln2_b"], p["w1"], p["b1"], p["w2"], p["b2"])


# ------------------------------ params ---------------------------------------


def init_params(key, depth, dim, mlp_dim):
    """Torch-equivalent params: Linear weights stored as (in, out) = W^T."""
    params = []
    for _ in range(depth):
        key, *ks = jax.random.split(key, 7)
        params.append({
            # LayerNorm affine params: torch default init (ones / zeros).
            "ln1_g": jnp.ones((1, dim), jnp.float32),
            "ln1_b": jnp.zeros((1, dim), jnp.float32),
            "ln2_g": jnp.ones((1, dim), jnp.float32),
            "ln2_b": jnp.zeros((1, dim), jnp.float32),
            "wqkv": 0.05 * jax.random.normal(ks[0], (dim, 3 * dim), jnp.float32),
            "wout": 0.05 * jax.random.normal(ks[1], (dim, dim), jnp.float32),
            "bout": 0.05 * jax.random.normal(ks[2], (1, dim), jnp.float32),
            "w1": 0.05 * jax.random.normal(ks[3], (dim, mlp_dim), jnp.float32),
            "b1": 0.05 * jax.random.normal(ks[4], (1, mlp_dim), jnp.float32),
            "w2": 0.05 * jax.random.normal(ks[5], (mlp_dim, dim), jnp.float32),
            "b2": jnp.zeros((1, dim), jnp.float32),
        })
    return params


def prepare_params(params, dim, heads):
    """One-time prep: stack all layers along a leading depth axis (one fused
    pallas_call over grid=(B, depth)), split q/k/v weights per head
    (depth, heads, D, dh) so the kernel only takes major-axis slices, fold the
    attention scale (dim ** -0.5, exactly as the reference Attention module;
    valid because to_qkv has no bias) into the q weights, and cast matmul
    weights to bf16 for the MXU. Biases / LayerNorm params stay f32."""
    depth = len(params)
    dh = dim // heads
    scale = float(dim) ** -0.5

    def stack(key):
        return jnp.stack([lp[key] for lp in params], axis=0)

    wqkv = stack("wqkv").astype(jnp.float32)               # (depth, D, 3D)
    wq = wqkv[:, :, 0 * dim:1 * dim] * scale               # fold logit scale
    wk = wqkv[:, :, 1 * dim:2 * dim]
    wv = wqkv[:, :, 2 * dim:3 * dim]

    def per_head(w):  # (depth, D, heads*dh) -> (depth, heads, D, dh)
        return w.reshape(depth, dim, heads, dh).transpose(0, 2, 1, 3)

    return {
        "ln1_g": stack("ln1_g"), "ln1_b": stack("ln1_b"),
        "ln2_g": stack("ln2_g"), "ln2_b": stack("ln2_b"),
        "wq": per_head(wq).astype(jnp.bfloat16),
        "wk": per_head(wk).astype(jnp.bfloat16),
        "wv": per_head(wv).astype(jnp.bfloat16),
        "wout": stack("wout").astype(jnp.bfloat16),
        "bout": stack("bout"),
        "w1": stack("w1").astype(jnp.bfloat16), "b1": stack("b1"),
        "w2": stack("w2").astype(jnp.bfloat16), "b2": stack("b2"),
    }


if __name__ == "__main__":
    B, N, D = 2, 8, 32
    heads, depth, mlp_dim = 4, 2, 64

    key = jax.random.PRNGKey(0)
    kx, kp = jax.random.split(key)
    x = jax.random.normal(kx, (B, N, D), dtype=jnp.float32)
    params = prepare_params(init_params(kp, depth, D, mlp_dim), D, heads)

    fwd = jax.jit(functools.partial(transformer_forward, heads=heads))
    y = fwd(x, params)
    jax.block_until_ready(y)
    assert y.shape == (B, N, D) and y.dtype == jnp.float32
    assert bool(jnp.all(jnp.isfinite(y)))
    print("KERNEL_OK")
</pallas_src>

<mosaic_0001>
module attributes {stable_mosaic.version = 11 : i64} {
  func.func @_fused_layer_kernel(%arg0: i32, %arg1: i32, %arg2: memref<1x8x32xf32, #tpu.memory_space<vmem>>, %arg3: memref<1x1x32xf32, #tpu.memory_space<vmem>>, %arg4: memref<1x1x32xf32, #tpu.memory_space<vmem>>, %arg5: memref<1x4x32x8xbf16, #tpu.memory_space<vmem>>, %arg6: memref<1x4x32x8xbf16, #tpu.memory_space<vmem>>, %arg7: memref<1x4x32x8xbf16, #tpu.memory_space<vmem>>, %arg8: memref<1x32x32xbf16, #tpu.memory_space<vmem>>, %arg9: memref<1x1x32xf32, #tpu.memory_space<vmem>>, %arg10: memref<1x1x32xf32, #tpu.memory_space<vmem>>, %arg11: memref<1x1x32xf32, #tpu.memory_space<vmem>>, %arg12: memref<1x32x64xbf16, #tpu.memory_space<vmem>>, %arg13: memref<1x1x64xf32, #tpu.memory_space<vmem>>, %arg14: memref<1x64x32xbf16, #tpu.memory_space<vmem>>, %arg15: memref<1x1x32xf32, #tpu.memory_space<vmem>>, %arg16: memref<1x8x32xf32, #tpu.memory_space<vmem>>) attributes {dimension_semantics = [#tpu.dimension_semantics<parallel>, #tpu.dimension_semantics<arbitrary>], iteration_bounds = array<i64: 2, 2>, scalar_prefetch = 0 : i64, scratch_operands = 0 : i64, tpu.core_type = #tpu.core_type<tc>, window_params = [{transform_indices = @transform_0, window_bounds = array<i64: 1, 8, 32>}, {transform_indices = @transform_1, window_bounds = array<i64: 1, 1, 32>}, {transform_indices = @transform_2, window_bounds = array<i64: 1, 1, 32>}, {transform_indices = @transform_3, window_bounds = array<i64: 1, 4, 32, 8>}, {transform_indices = @transform_4, window_bounds = array<i64: 1, 4, 32, 8>}, {transform_indices = @transform_5, window_bounds = array<i64: 1, 4, 32, 8>}, {transform_indices = @transform_6, window_bounds = array<i64: 1, 32, 32>}, {transform_indices = @transform_7, window_bounds = array<i64: 1, 1, 32>}, {transform_indices = @transform_8, window_bounds = array<i64: 1, 1, 32>}, {transform_indices = @transform_9, window_bounds = array<i64: 1, 1, 32>}, {transform_indices = @transform_10, window_bounds = array<i64: 1, 32, 64>}, {transform_indices = @transform_11, window_bounds = array<i64: 1, 1, 64>}, {transform_indices = @transform_12, window_bounds = array<i64: 1, 64, 32>}, {transform_indices = @transform_13, window_bounds = array<i64: 1, 1, 32>}, {transform_indices = @transform_14, window_bounds = array<i64: 1, 8, 32>}]} {
    %c0_i32 = arith.constant 0 : i32
    %0 = arith.cmpi eq, %arg1, %c0_i32 : i32
    %1 = arith.extui %0 : i1 to i32
    %c0_i32_0 = arith.constant 0 : i32
    %2 = arith.cmpi ne, %1, %c0_i32_0 : i32
    scf.if %2 {
      %c0_104 = arith.constant 0 : index
      %c0_105 = arith.constant 0 : index
      %c0_106 = arith.constant 0 : index
      %235 = vector.load %arg2[%c0_104, %c0_105, %c0_106] : memref<1x8x32xf32, #tpu.memory_space<vmem>>, vector<1x8x32xf32>
      %236 = vector.shape_cast %235 : vector<1x8x32xf32> to vector<8x32xf32>
      %c0_107 = arith.constant 0 : index
      %c0_108 = arith.constant 0 : index
      %c0_109 = arith.constant 0 : index
      %237 = vector.load %arg16[%c0_107, %c0_108, %c0_109] : memref<1x8x32xf32, #tpu.memory_space<vmem>>, vector<1x8x32xf32>
      %238 = vector.shape_cast %237 : vector<1x8x32xf32> to vector<8x32xf32>
      %239 = vector.shape_cast %236 : vector<8x32xf32> to vector<1x8x32xf32>
      tpu.vector_store %arg16[%c0_107, %c0_108, %c0_109], %239 {strides = array<i32>} : memref<1x8x32xf32, #tpu.memory_space<vmem>>, vector<1x8x32xf32>,
    } else {
    }
    %c0 = arith.constant 0 : index
    %c0_1 = arith.constant 0 : index
    %c0_2 = arith.constant 0 : index
    %3 = vector.load %arg16[%c0, %c0_1, %c0_2] : memref<1x8x32xf32, #tpu.memory_space<vmem>>, vector<1x8x32xf32>
    %4 = vector.shape_cast %3 : vector<1x8x32xf32> to vector<8x32xf32>
    %c0_3 = arith.constant 0 : index
    %c0_4 = arith.constant 0 : index
    %c0_5 = arith.constant 0 : index
    %5 = vector.load %arg3[%c0_3, %c0_4, %c0_5] : memref<1x1x32xf32, #tpu.memory_space<vmem>>, vector<1x1x32xf32>
    %6 = vector.shape_cast %5 : vector<1x1x32xf32> to vector<1x32xf32>
    %c0_6 = arith.constant 0 : index
    %c0_7 = arith.constant 0 : index
    %c0_8 = arith.constant 0 : index
    %7 = vector.load %arg4[%c0_6, %c0_7, %c0_8] : memref<1x1x32xf32, #tpu.memory_space<vmem>>, vector<1x1x32xf32>
    %8 = vector.shape_cast %7 : vector<1x1x32xf32> to vector<1x32xf32>
    %cst = arith.constant dense<0.000000e+00> : vector<8xf32>
    %9 = vector.multi_reduction <add>, %4, %cst [1] : vector<8x32xf32> to vector<8xf32>
    %10 = vector.shape_cast %9 : vector<8xf32> to vector<8x1xf32>
    %cst_9 = arith.constant 3.200000e+01 : f32
    %11 = vector.broadcast %cst_9 : f32 to vector<8x1xf32>
    %12 = arith.divf %10, %11 : vector<8x1xf32>
    %13 = vector.broadcast %12 : vector<8x1xf32> to vector<8x32xf32>
    %14 = arith.subf %4, %13 : vector<8x32xf32>
    %15 = arith.mulf %14, %14 : vector<8x32xf32>
    %cst_10 = arith.constant dense<0.000000e+00> : vector<8xf32>
    %16 = vector.multi_reduction <add>, %15, %cst_10 [1] : vector<8x32xf32> to vector<8xf32>
    %17 = vector.shape_cast %16 : vector<8xf32> to vector<8x1xf32>
    %cst_11 = arith.constant 3.200000e+01 : f32
    %18 = vector.broadcast %cst_11 : f32 to vector<8x1xf32>
    %19 = arith.divf %17, %18 : vector<8x1xf32>
    %20 = vector.broadcast %12 : vector<8x1xf32> to vector<8x32xf32>
    %21 = arith.subf %4, %20 : vector<8x32xf32>
    %cst_12 = arith.constant 9.99999974E-6 : f32
    %22 = vector.broadcast %cst_12 : f32 to vector<8x1xf32>
    %23 = arith.addf %19, %22 : vector<8x1xf32>
    %24 = math.rsqrt %23 : vector<8x1xf32>
    %25 = vector.broadcast %24 : vector<8x1xf32> to vector<8x32xf32>
    %26 = arith.mulf %21, %25 : vector<8x32xf32>
    %27 = vector.broadcast %6 : vector<1x32xf32> to vector<8x32xf32>
    %28 = arith.mulf %26, %27 : vector<8x32xf32>
    %29 = vector.broadcast %8 : vector<1x32xf32> to vector<8x32xf32>
    %30 = arith.addf %28, %29 : vector<8x32xf32>
    %31 = arith.truncf %30 : vector<8x32xf32> to vector<8x32xbf16>
    %c0_13 = arith.constant 0 : index
    %c0_14 = arith.constant 0 : index
    %c0_15 = arith.constant 0 : index
    %c0_16 = arith.constant 0 : index
    %32 = vector.load %arg5[%c0_13, %c0_14, %c0_15, %c0_16] : memref<1x4x32x8xbf16, #tpu.memory_space<vmem>>, vector<1x4x32x8xbf16>
    %33 = vector.shape_cast %32 : vector<1x4x32x8xbf16> to vector<4x32x8xbf16>
    %c0_17 = arith.constant 0 : index
    %c0_18 = arith.constant 0 : index
    %c0_19 = arith.constant 0 : index
    %c0_20 = arith.constant 0 : index
    %34 = vector.load %arg6[%c0_17, %c0_18, %c0_19, %c0_20] : memref<1x4x32x8xbf16, #tpu.memory_space<vmem>>, vector<1x4x32x8xbf16>
    %35 = vector.shape_cast %34 : vector<1x4x32x8xbf16> to vector<4x32x8xbf16>
    %c0_21 = arith.constant 0 : index
    %c0_22 = arith.constant 0 : index
    %c0_23 = arith.constant 0 : index
    %c0_24 = arith.constant 0 : index
    %36 = vector.load %arg7[%c0_21, %c0_22, %c0_23, %c0_24] : memref<1x4x32x8xbf16, #tpu.memory_space<vmem>>, vector<1x4x32x8xbf16>
    %37 = vector.shape_cast %36 : vector<1x4x32x8xbf16> to vector<4x32x8xbf16>
    %38 = vector.extract_strided_slice %33 {offsets = [0, 0, 0], sizes = [1, 32, 8], strides = [1, 1, 1]} : vector<4x32x8xbf16> to vector<1x32x8xbf16>
    %39 = vector.shape_cast %38 : vector<1x32x8xbf16> to vector<32x8xbf16>
    %cst_25 = arith.constant dense<0.000000e+00> : vector<8x8xf32>
    %40 = tpu.matmul %31, %39, %cst_25 {dimension_numbers = #tpu.dot_dimension_numbers<[1], [0], [0], [1], [0, 0, 1, 1], [], []>} : vector<8x32xbf16>, vector<32x8xbf16>, vector<8x8xf32> -> vector<8x8xf32>
    %41 = vector.extract_strided_slice %35 {offsets = [0, 0, 0], sizes = [1, 32, 8], strides = [1, 1, 1]} : vector<4x32x8xbf16> to vector<1x32x8xbf16>
    %42 = vector.shape_cast %41 : vector<1x32x8xbf16> to vector<32x8xbf16>
    %cst_26 = arith.constant dense<0.000000e+00> : vector<8x8xf32>
    %43 = tpu.matmul %31, %42, %cst_26 {dimension_numbers = #tpu.dot_dimension_numbers<[1], [0], [0], [1], [0, 0, 1, 1], [], []>} : vector<8x32xbf16>, vector<32x8xbf16>, vector<8x8xf32> -> vector<8x8xf32>
    %44 = vector.extract_strided_slice %37 {offsets = [0, 0, 0], sizes = [1, 32, 8], strides = [1, 1, 1]} : vector<4x32x8xbf16> to vector<1x32x8xbf16>
    %45 = vector.shape_cast %44 : vector<1x32x8xbf16> to vector<32x8xbf16>
    %cst_27 = arith.constant dense<0.000000e+00> : vector<8x8xf32>
    %46 = tpu.matmul %31, %45, %cst_27 {dimension_numbers = #tpu.dot_dimension_numbers<[1], [0], [0], [1], [0, 0, 1, 1], [], []>} : vector<8x32xbf16>, vector<32x8xbf16>, vector<8x8xf32> -> vector<8x8xf32>
    %47 = arith.truncf %40 : vector<8x8xf32> to vector<8x8xbf16>
    %48 = arith.truncf %43 : vector<8x8xf32> to vector<8x8xbf16>
    %cst_28 = arith.constant dense<0.000000e+00> : vector<8x8xf32>
    %49 = tpu.matmul %47, %48, %cst_28 {dimension_numbers = #tpu.dot_dimension_numbers<[1], [1], [0], [0], [0, 0, 1, 0], [], []>} : vector<8x8xbf16>, vector<8x8xbf16>, vector<8x8xf32> -> vector<8x8xf32>
    %cst_29 = arith.constant dense<0xFF800000> : vector<8xf32>
    %50 = vector.multi_reduction <maximumf>, %49, %cst_29 [1] : vector<8x8xf32> to vector<8xf32>
    %51 = vector.shape_cast %50 : vector<8xf32> to vector<8x1xf32>
    %52 = vector.broadcast %51 : vector<8x1xf32> to vector<8x8xf32>
    %53 = arith.subf %49, %52 : vector<8x8xf32>
    %54 = math.exp %53 : vector<8x8xf32>
    %cst_30 = arith.constant dense<0.000000e+00> : vector<8xf32>
    %55 = vector.multi_reduction <add>, %54, %cst_30 [1] : vector<8x8xf32> to vector<8xf32>
    %56 = vector.shape_cast %55 : vector<8xf32> to vector<8x1xf32>
    %57 = tpu.reciprocal %56 {approx = true} : vector<8x1xf32> -> vector<8x1xf32>
    %58 = vector.broadcast %57 : vector<8x1xf32> to vector<8x8xf32>
    %59 = arith.mulf %54, %58 : vector<8x8xf32>
    %60 = arith.truncf %59 : vector<8x8xf32> to vector<8x8xbf16>
    %61 = arith.truncf %46 : vector<8x8xf32> to vector<8x8xbf16>
    %cst_31 = arith.constant dense<0.000000e+00> : vector<8x8xf32>
    %62 = tpu.matmul %60, %61, %cst_31 {dimension_numbers = #tpu.dot_dimension_numbers<[1], [0], [0], [1], [0, 0, 1, 1], [], []>} : vector<8x8xbf16>, vector<8x8xbf16>, vector<8x8xf32> -> vector<8x8xf32>
    %63 = vector.extract_strided_slice %33 {offsets = [1, 0, 0], sizes = [1, 32, 8], strides = [1, 1, 1]} : vector<4x32x8xbf16> to vector<1x32x8xbf16>
    %64 = vector.shape_cast %63 : vector<1x32x8xbf16> to vector<32x8xbf16>
    %cst_32 = arith.constant dense<0.000000e+00> : vector<8x8xf32>
    %65 = tpu.matmul %31, %64, %cst_32 {dimension_numbers = #tpu.dot_dimension_numbers<[1], [0], [0], [1], [0, 0, 1, 1], [], []>} : vector<8x32xbf16>, vector<32x8xbf16>, vector<8x8xf32> -> vector<8x8xf32>
    %66 = vector.extract_strided_slice %35 {offsets = [1, 0, 0], sizes = [1, 32, 8], strides = [1, 1, 1]} : vector<4x32x8xbf16> to vector<1x32x8xbf16>
    %67 = vector.shape_cast %66 : vector<1x32x8xbf16> to vector<32x8xbf16>
    %cst_33 = arith.constant dense<0.000000e+00> : vector<8x8xf32>
    %68 = tpu.matmul %31, %67, %cst_33 {dimension_numbers = #tpu.dot_dimension_numbers<[1], [0], [0], [1], [0, 0, 1, 1], [], []>} : vector<8x32xbf16>, vector<32x8xbf16>, vector<8x8xf32> -> vector<8x8xf32>
    %69 = vector.extract_strided_slice %37 {offsets = [1, 0, 0], sizes = [1, 32, 8], strides = [1, 1, 1]} : vector<4x32x8xbf16> to vector<1x32x8xbf16>
    %70 = vector.shape_cast %69 : vector<1x32x8xbf16> to vector<32x8xbf16>
    %cst_34 = arith.constant dense<0.000000e+00> : vector<8x8xf32>
    %71 = tpu.matmul %31, %70, %cst_34 {dimension_numbers = #tpu.dot_dimension_numbers<[1], [0], [0], [1], [0, 0, 1, 1], [], []>} : vector<8x32xbf16>, vector<32x8xbf16>, vector<8x8xf32> -> vector<8x8xf32>
    %72 = arith.truncf %65 : vector<8x8xf32> to vector<8x8xbf16>
    %73 = arith.truncf %68 : vector<8x8xf32> to vector<8x8xbf16>
    %cst_35 = arith.constant dense<0.000000e+00> : vector<8x8xf32>
    %74 = tpu.matmul %72, %73, %cst_35 {dimension_numbers = #tpu.dot_dimension_numbers<[1], [1], [0], [0], [0, 0, 1, 0], [], []>} : vector<8x8xbf16>, vector<8x8xbf16>, vector<8x8xf32> -> vector<8x8xf32>
    %cst_36 = arith.constant dense<0xFF800000> : vector<8xf32>
    %75 = vector.multi_reduction <maximumf>, %74, %cst_36 [1] : vector<8x8xf32> to vector<8xf32>
    %76 = vector.shape_cast %75 : vector<8xf32> to vector<8x1xf32>
    %77 = vector.broadcast %76 : vector<8x1xf32> to vector<8x8xf32>
    %78 = arith.subf %74, %77 : vector<8x8xf32>
    %79 = math.exp %78 : vector<8x8xf32>
    %cst_37 = arith.constant dense<0.000000e+00> : vector<8xf32>
    %80 = vector.multi_reduction <add>, %79, %cst_37 [1] : vector<8x8xf32> to vector<8xf32>
    %81 = vector.shape_cast %80 : vector<8xf32> to vector<8x1xf32>
    %82 = tpu.reciprocal %81 {approx = true} : vector<8x1xf32> -> vector<8x1xf32>
    %83 = vector.broadcast %82 : vector<8x1xf32> to vector<8x8xf32>
    %84 = arith.mulf %79, %83 : vector<8x8xf32>
    %85 = arith.truncf %84 : vector<8x8xf32> to vector<8x8xbf16>
    %86 = arith.truncf %71 : vector<8x8xf32> to vector<8x8xbf16>
    %cst_38 = arith.constant dense<0.000000e+00> : vector<8x8xf32>
    %87 = tpu.matmul %85, %86, %cst_38 {dimension_numbers = #tpu.dot_dimension_numbers<[1], [0], [0], [1], [0, 0, 1, 1], [], []>} : vector<8x8xbf16>, vector<8x8xbf16>, vector<8x8xf32> -> vector<8x8xf32>
    %88 = vector.extract_strided_slice %33 {offsets = [2, 0, 0], sizes = [1, 32, 8], strides = [1, 1, 1]} : vector<4x32x8xbf16> to vector<1x32x8xbf16>
    %89 = vector.shape_cast %88 : vector<1x32x8xbf16> to vector<32x8xbf16>
    %cst_39 = arith.constant dense<0.000000e+00> : vector<8x8xf32>
    %90 = tpu.matmul %31, %89, %cst_39 {dimension_numbers = #tpu.dot_dimension_numbers<[1], [0], [0], [1], [0, 0, 1, 1], [], []>} : vector<8x32xbf16>, vector<32x8xbf16>, vector<8x8xf32> -> vector<8x8xf32>
    %91 = vector.extract_strided_slice %35 {offsets = [2, 0, 0], sizes = [1, 32, 8], strides = [1, 1, 1]} : vector<4x32x8xbf16> to vector<1x32x8xbf16>
    %92 = vector.shape_cast %91 : vector<1x32x8xbf16> to vector<32x8xbf16>
    %cst_40 = arith.constant dense<0.000000e+00> : vector<8x8xf32>
    %93 = tpu.matmul %31, %92, %cst_40 {dimension_numbers = #tpu.dot_dimension_numbers<[1], [0], [0], [1], [0, 0, 1, 1], [], []>} : vector<8x32xbf16>, vector<32x8xbf16>, vector<8x8xf32> -> vector<8x8xf32>
    %94 = vector.extract_strided_slice %37 {offsets = [2, 0, 0], sizes = [1, 32, 8], strides = [1, 1, 1]} : vector<4x32x8xbf16> to vector<1x32x8xbf16>
    %95 = vector.shape_cast %94 : vector<1x32x8xbf16> to vector<32x8xbf16>
    %cst_41 = arith.constant dense<0.000000e+00> : vector<8x8xf32>
    %96 = tpu.matmul %31, %95, %cst_41 {dimension_numbers = #tpu.dot_dimension_numbers<[1], [0], [0], [1], [0, 0, 1, 1], [], []>} : vector<8x32xbf16>, vector<32x8xbf16>, vector<8x8xf32> -> vector<8x8xf32>
    %97 = arith.truncf %90 : vector<8x8xf32> to vector<8x8xbf16>
    %98 = arith.truncf %93 : vector<8x8xf32> to vector<8x8xbf16>
    %cst_42 = arith.constant dense<0.000000e+00> : vector<8x8xf32>
    %99 = tpu.matmul %97, %98, %cst_42 {dimension_numbers = #tpu.dot_dimension_numbers<[1], [1], [0], [0], [0, 0, 1, 0], [], []>} : vector<8x8xbf16>, vector<8x8xbf16>, vector<8x8xf32> -> vector<8x8xf32>
    %cst_43 = arith.constant dense<0xFF800000> : vector<8xf32>
    %100 = vector.multi_reduction <maximumf>, %99, %cst_43 [1] : vector<8x8xf32> to vector<8xf32>
    %101 = vector.shape_cast %100 : vector<8xf32> to vector<8x1xf32>
    %102 = vector.broadcast %101 : vector<8x1xf32> to vector<8x8xf32>
    %103 = arith.subf %99, %102 : vector<8x8xf32>
    %104 = math.exp %103 : vector<8x8xf32>
    %cst_44 = arith.constant dense<0.000000e+00> : vector<8xf32>
    %105 = vector.multi_reduction <add>, %104, %cst_44 [1] : vector<8x8xf32> to vector<8xf32>
    %106 = vector.shape_cast %105 : vector<8xf32> to vector<8x1xf32>
    %107 = tpu.reciprocal %106 {approx = true} : vector<8x1xf32> -> vector<8x1xf32>
    %108 = vector.broadcast %107 : vector<8x1xf32> to vector<8x8xf32>
    %109 = arith.mulf %104, %108 : vector<8x8xf32>
    %110 = arith.truncf %109 : vector<8x8xf32> to vector<8x8xbf16>
    %111 = arith.truncf %96 : vector<8x8xf32> to vector<8x8xbf16>
    %cst_45 = arith.constant dense<0.000000e+00> : vector<8x8xf32>
    %112 = tpu.matmul %110, %111, %cst_45 {dimension_numbers = #tpu.dot_dimension_numbers<[1], [0], [0], [1], [0, 0, 1, 1], [], []>} : vector<8x8xbf16>, vector<8x8xbf16>, vector<8x8xf32> -> vector<8x8xf32>
    %113 = vector.extract_strided_slice %33 {offsets = [3, 0, 0], sizes = [1, 32, 8], strides = [1, 1, 1]} : vector<4x32x8xbf16> to vector<1x32x8xbf16>
    %114 = vector.shape_cast %113 : vector<1x32x8xbf16> to vector<32x8xbf16>
    %cst_46 = arith.constant dense<0.000000e+00> : vector<8x8xf32>
    %115 = tpu.matmul %31, %114, %cst_46 {dimension_numbers = #tpu.dot_dimension_numbers<[1], [0], [0], [1], [0, 0, 1, 1], [], []>} : vector<8x32xbf16>, vector<32x8xbf16>, vector<8x8xf32> -> vector<8x8xf32>
    %116 = vector.extract_strided_slice %35 {offsets = [3, 0, 0], sizes = [1, 32, 8], strides = [1, 1, 1]} : vector<4x32x8xbf16> to vector<1x32x8xbf16>
    %117 = vector.shape_cast %116 : vector<1x32x8xbf16> to vector<32x8xbf16>
    %cst_47 = arith.constant dense<0.000000e+00> : vector<8x8xf32>
    %118 = tpu.matmul %31, %117, %cst_47 {dimension_numbers = #tpu.dot_dimension_numbers<[1], [0], [0], [1], [0, 0, 1, 1], [], []>} : vector<8x32xbf16>, vector<32x8xbf16>, vector<8x8xf32> -> vector<8x8xf32>
    %119 = vector.extract_strided_slice %37 {offsets = [3, 0, 0], sizes = [1, 32, 8], strides = [1, 1, 1]} : vector<4x32x8xbf16> to vector<1x32x8xbf16>
    %120 = vector.shape_cast %119 : vector<1x32x8xbf16> to vector<32x8xbf16>
    %cst_48 = arith.constant dense<0.000000e+00> : vector<8x8xf32>
    %121 = tpu.matmul %31, %120, %cst_48 {dimension_numbers = #tpu.dot_dimension_numbers<[1], [0], [0], [1], [0, 0, 1, 1], [], []>} : vector<8x32xbf16>, vector<32x8xbf16>, vector<8x8xf32> -> vector<8x8xf32>
    %122 = arith.truncf %115 : vector<8x8xf32> to vector<8x8xbf16>
    %123 = arith.truncf %118 : vector<8x8xf32> to vector<8x8xbf16>
    %cst_49 = arith.constant dense<0.000000e+00> : vector<8x8xf32>
    %124 = tpu.matmul %122, %123, %cst_49 {dimension_numbers = #tpu.dot_dimension_numbers<[1], [1], [0], [0], [0, 0, 1, 0], [], []>} : vector<8x8xbf16>, vector<8x8xbf16>, vector<8x8xf32> -> vector<8x8xf32>
    %cst_50 = arith.constant dense<0xFF800000> : vector<8xf32>
    %125 = vector.multi_reduction <maximumf>, %124, %cst_50 [1] : vector<8x8xf32> to vector<8xf32>
    %126 = vector.shape_cast %125 : vector<8xf32> to vector<8x1xf32>
    %127 = vector.broadcast %126 : vector<8x1xf32> to vector<8x8xf32>
    %128 = arith.subf %124, %127 : vector<8x8xf32>
    %129 = math.exp %128 : vector<8x8xf32>
    %cst_51 = arith.constant dense<0.000000e+00> : vector<8xf32>
    %130 = vector.multi_reduction <add>, %129, %cst_51 [1] : vector<8x8xf32> to vector<8xf32>
    %131 = vector.shape_cast %130 : vector<8xf32> to vector<8x1xf32>
    %132 = tpu.reciprocal %131 {approx = true} : vector<8x1xf32> -> vector<8x1xf32>
    %133 = vector.broadcast %132 : vector<8x1xf32> to vector<8x8xf32>
    %134 = arith.mulf %129, %133 : vector<8x8xf32>
    %135 = arith.truncf %134 : vector<8x8xf32> to vector<8x8xbf16>
    %136 = arith.truncf %121 : vector<8x8xf32> to vector<8x8xbf16>
    %cst_52 = arith.constant dense<0.000000e+00> : vector<8x8xf32>
    %137 = tpu.matmul %135, %136, %cst_52 {dimension_numbers = #tpu.dot_dimension_numbers<[1], [0], [0], [1], [0, 0, 1, 1], [], []>} : vector<8x8xbf16>, vector<8x8xbf16>, vector<8x8xf32> -> vector<8x8xf32>
    %138 = tpu.concatenate %62, %87, %112, %137 in 1 : vector<8x8xf32>, vector<8x8xf32>, vector<8x8xf32>, vector<8x8xf32> -> vector<8x32xf32>
    %139 = arith.truncf %138 : vector<8x32xf32> to vector<8x32xbf16>
    %c0_53 = arith.constant 0 : index
    %c0_54 = arith.constant 0 : index
    %c0_55 = arith.constant 0 : index
    %140 = vector.load %arg8[%c0_53, %c0_54, %c0_55] : memref<1x32x32xbf16, #tpu.memory_space<vmem>>, vector<1x32x32xbf16>
    %141 = vector.shape_cast %140 : vector<1x32x32xbf16> to vector<32x32xbf16>
    %cst_56 = arith.constant dense<0.000000e+00> : vector<8x32xf32>
    %142 = tpu.matmul %139, %141, %cst_56 {dimension_numbers = #tpu.dot_dimension_numbers<[1], [0], [0], [1], [0, 0, 1, 1], [], []>} : vector<8x32xbf16>, vector<32x32xbf16>, vector<8x32xf32> -> vector<8x32xf32>
    %143 = arith.addf %4, %142 : vector<8x32xf32>
    %c0_57 = arith.constant 0 : index
    %c0_58 = arith.constant 0 : index
    %c0_59 = arith.constant 0 : index
    %144 = vector.load %arg9[%c0_57, %c0_58, %c0_59] : memref<1x1x32xf32, #tpu.memory_space<vmem>>, vector<1x1x32xf32>
    %145 = vector.shape_cast %144 : vector<1x1x32xf32> to vector<1x32xf32>
    %146 = vector.broadcast %145 : vector<1x32xf32> to vector<8x32xf32>
    %147 = arith.addf %143, %146 : vector<8x32xf32>
    %c0_60 = arith.constant 0 : index
    %c0_61 = arith.constant 0 : index
    %c0_62 = arith.constant 0 : index
    %148 = vector.load %arg10[%c0_60, %c0_61, %c0_62] : memref<1x1x32xf32, #tpu.memory_space<vmem>>, vector<1x1x32xf32>
    %149 = vector.shape_cast %148 : vector<1x1x32xf32> to vector<1x32xf32>
    %c0_63 = arith.constant 0 : index
    %c0_64 = arith.constant 0 : index
    %c0_65 = arith.constant 0 : index
    %150 = vector.load %arg11[%c0_63, %c0_64, %c0_65] : memref<1x1x32xf32, #tpu.memory_space<vmem>>, vector<1x1x32xf32>
    %151 = vector.shape_cast %150 : vector<1x1x32xf32> to vector<1x32xf32>
    %cst_66 = arith.constant dense<0.000000e+00> : vector<8xf32>
    %152 = vector.multi_reduction <add>, %147, %cst_66 [1] : vector<8x32xf32> to vector<8xf32>
    %153 = vector.shape_cast %152 : vector<8xf32> to vector<8x1xf32>
    %cst_67 = arith.constant 3.200000e+01 : f32
    %154 = vector.broadcast %cst_67 : f32 to vector<8x1xf32>
    %155 = arith.divf %153, %154 : vector<8x1xf32>
    %156 = vector.broadcast %155 : vector<8x1xf32> to vector<8x32xf32>
    %157 = arith.subf %147, %156 : vector<8x32xf32>
    %158 = arith.mulf %157, %157 : vector<8x32xf32>
    %cst_68 = arith.constant dense<0.000000e+00> : vector<8xf32>
    %159 = vector.multi_reduction <add>, %158, %cst_68 [1] : vector<8x32xf32> to vector<8xf32>
    %160 = vector.shape_cast %159 : vector<8xf32> to vector<8x1xf32>
    %cst_69 = arith.constant 3.200000e+01 : f32
    %161 = vector.broadcast %cst_69 : f32 to vector<8x1xf32>
    %162 = arith.divf %160, %161 : vector<8x1xf32>
    %163 = vector.broadcast %155 : vector<8x1xf32> to vector<8x32xf32>
    %164 = arith.subf %147, %163 : vector<8x32xf32>
    %cst_70 = arith.constant 9.99999974E-6 : f32
    %165 = vector.broadcast %cst_70 : f32 to vector<8x1xf32>
    %166 = arith.addf %162, %165 : vector<8x1xf32>
    %167 = math.rsqrt %166 : vector<8x1xf32>
    %168 = vector.broadcast %167 : vector<8x1xf32> to vector<8x32xf32>
    %169 = arith.mulf %164, %168 : vector<8x32xf32>
    %170 = vector.broadcast %149 : vector<1x32xf32> to vector<8x32xf32>
    %171 = arith.mulf %169, %170 : vector<8x32xf32>
    %172 = vector.broadcast %151 : vector<1x32xf32> to vector<8x32xf32>
    %173 = arith.addf %171, %172 : vector<8x32xf32>
    %174 = arith.truncf %173 : vector<8x32xf32> to vector<8x32xbf16>
    %c0_71 = arith.constant 0 : index
    %c0_72 = arith.constant 0 : index
    %c0_73 = arith.constant 0 : index
    %175 = vector.load %arg12[%c0_71, %c0_72, %c0_73] : memref<1x32x64xbf16, #tpu.memory_space<vmem>>, vector<1x32x64xbf16>
    %176 = vector.shape_cast %175 : vector<1x32x64xbf16> to vector<32x64xbf16>
    %cst_74 = arith.constant dense<0.000000e+00> : vector<8x64xf32>
    %177 = tpu.matmul %174, %176, %cst_74 {dimension_numbers = #tpu.dot_dimension_numbers<[1], [0], [0], [1], [0, 0, 1, 1], [], []>} : vector<8x32xbf16>, vector<32x64xbf16>, vector<8x64xf32> -> vector<8x64xf32>
    %c0_75 = arith.constant 0 : index
    %c0_76 = arith.constant 0 : index
    %c0_77 = arith.constant 0 : index
    %178 = vector.load %arg13[%c0_75, %c0_76, %c0_77] : memref<1x1x64xf32, #tpu.memory_space<vmem>>, vector<1x1x64xf32>
    %179 = vector.shape_cast %178 : vector<1x1x64xf32> to vector<1x64xf32>
    %180 = vector.broadcast %179 : vector<1x64xf32> to vector<8x64xf32>
    %181 = arith.addf %177, %180 : vector<8x64xf32>
    %cst_78 = arith.constant 5.000000e-01 : f32
    %182 = vector.broadcast %cst_78 : f32 to vector<8x64xf32>
    %183 = arith.mulf %182, %181 : vector<8x64xf32>
    %cst_79 = arith.constant 0.707106769 : f32
    %184 = vector.broadcast %cst_79 : f32 to vector<8x64xf32>
    %185 = arith.mulf %181, %184 : vector<8x64xf32>
    %cst_80 = arith.constant 0.000000e+00 : f32
    %186 = vector.broadcast %cst_80 : f32 to vector<8x64xf32>
    %187 = arith.cmpf oge, %185, %186 : vector<8x64xf32>
    %cst_81 = arith.constant 1.000000e+00 : f32
    %cst_82 = arith.constant -1.000000e+00 : f32
    %188 = vector.broadcast %cst_81 : f32 to vector<8x64xf32>
    %189 = vector.broadcast %cst_82 : f32 to vector<8x64xf32>
    %190 = arith.select %187, %188, %189 : vector<8x64xi1>, vector<8x64xf32>
    %191 = math.absf %185 : vector<8x64xf32>
    %cst_83 = arith.constant 0.327591091 : f32
    %192 = vector.broadcast %cst_83 : f32 to vector<8x64xf32>
    %193 = arith.mulf %192, %191 : vector<8x64xf32>
    %cst_84 = arith.constant 1.000000e+00 : f32
    %194 = vector.broadcast %cst_84 : f32 to vector<8x64xf32>
    %195 = arith.addf %194, %193 : vector<8x64xf32>
    %cst_85 = arith.constant 1.000000e+00 : f32
    %196 = vector.broadcast %cst_85 : f32 to vector<8x64xf32>
    %197 = arith.divf %196, %195 : vector<8x64xf32>
    %cst_86 = arith.constant 1.06140542 : f32
    %198 = vector.broadcast %cst_86 : f32 to vector<8x64xf32>
    %199 = arith.mulf %197, %198 : vector<8x64xf32>
    %cst_87 = arith.constant -1.45315206 : f32
    %200 = vector.broadcast %cst_87 : f32 to vector<8x64xf32>
    %201 = arith.addf %200, %199 : vector<8x64xf32>
    %202 = arith.mulf %197, %201 : vector<8x64xf32>
    %cst_88 = arith.constant 1.42141378 : f32
    %203 = vector.broadcast %cst_88 : f32 to vector<8x64xf32>
    %204 = arith.addf %203, %202 : vector<8x64xf32>
    %205 = arith.mulf %197, %204 : vector<8x64xf32>
    %cst_89 = arith.constant -0.284496725 : f32
    %206 = vector.broadcast %cst_89 : f32 to vector<8x64xf32>
    %207 = arith.addf %206, %205 : vector<8x64xf32>
    %208 = arith.mulf %197, %207 : vector<8x64xf32>
    %cst_90 = arith.constant 0.254829586 : f32
    %209 = vector.broadcast %cst_90 : f32 to vector<8x64xf32>
    %210 = arith.addf %209, %208 : vector<8x64xf32>
    %211 = arith.mulf %197, %210 : vector<8x64xf32>
    %cst_91 = arith.constant 0.000000e+00 : f32
    %212 = vector.broadcast %cst_91 : f32 to vector<8x64xf32>
    %213 = arith.subf %212, %191 : vector<8x64xf32>
    %214 = arith.mulf %213, %191 : vector<8x64xf32>
    %215 = math.exp %214 : vector<8x64xf32>
    %216 = arith.mulf %211, %215 : vector<8x64xf32>
    %cst_92 = arith.constant 1.000000e+00 : f32
    %217 = vector.broadcast %cst_92 : f32 to vector<8x64xf32>
    %218 = arith.subf %217, %216 : vector<8x64xf32>
    %219 = arith.mulf %190, %218 : vector<8x64xf32>
    %cst_93 = arith.constant 1.000000e+00 : f32
    %220 = vector.broadcast %cst_93 : f32 to vector<8x64xf32>
    %221 = arith.addf %220, %219 : vector<8x64xf32>
    %222 = arith.mulf %183, %221 : vector<8x64xf32>
    %223 = arith.truncf %222 : vector<8x64xf32> to vector<8x64xbf16>
    %c0_94 = arith.constant 0 : index
    %c0_95 = arith.constant 0 : index
    %c0_96 = arith.constant 0 : index
    %224 = vector.load %arg14[%c0_94, %c0_95, %c0_96] : memref<1x64x32xbf16, #tpu.memory_space<vmem>>, vector<1x64x32xbf16>
    %225 = vector.shape_cast %224 : vector<1x64x32xbf16> to vector<64x32xbf16>
    %cst_97 = arith.constant dense<0.000000e+00> : vector<8x32xf32>
    %226 = tpu.matmul %223, %225, %cst_97 {dimension_numbers = #tpu.dot_dimension_numbers<[1], [0], [0], [1], [0, 0, 1, 1], [], []>} : vector<8x64xbf16>, vector<64x32xbf16>, vector<8x32xf32> -> vector<8x32xf32>
    %c0_98 = arith.constant 0 : index
    %c0_99 = arith.constant 0 : index
    %c0_100 = arith.constant 0 : index
    %227 = vector.load %arg15[%c0_98, %c0_99, %c0_100] : memref<1x1x32xf32, #tpu.memory_space<vmem>>, vector<1x1x32xf32>
    %228 = vector.shape_cast %227 : vector<1x1x32xf32> to vector<1x32xf32>
    %229 = vector.broadcast %228 : vector<1x32xf32> to vector<8x32xf32>
    %230 = arith.addf %226, %229 : vector<8x32xf32>
    %231 = arith.addf %147, %230 : vector<8x32xf32>
    %c0_101 = arith.constant 0 : index
    %c0_102 = arith.constant 0 : index
    %c0_103 = arith.constant 0 : index
    %232 = vector.load %arg16[%c0_101, %c0_102, %c0_103] : memref<1x8x32xf32, #tpu.memory_space<vmem>>, vector<1x8x32xf32>
    %233 = vector.shape_cast %232 : vector<1x8x32xf32> to vector<8x32xf32>
    %234 = vector.shape_cast %231 : vector<8x32xf32> to vector<1x8x32xf32>
    tpu.vector_store %arg16[%c0_101, %c0_102, %c0_103], %234 {strides = array<i32>} : memref<1x8x32xf32, #tpu.memory_space<vmem>>, vector<1x8x32xf32>,
    return
  }
  func.func @transform_0(%arg0: i32, %arg1: i32) -> (i32, i32, i32) {
    %c0_i32 = arith.constant 0 : i32
    %c0_i32_0 = arith.constant 0 : i32
    %c0_i32_1 = arith.constant 0 : i32
    return %arg0, %c0_i32, %c0_i32_0 : i32, i32, i32
  }
  func.func @transform_1(%arg0: i32, %arg1: i32) -> (i32, i32, i32) {
    %c0_i32 = arith.constant 0 : i32
    %c0_i32_0 = arith.constant 0 : i32
    %c0_i32_1 = arith.constant 0 : i32
    return %arg1, %c0_i32, %c0_i32_0 : i32, i32, i32
  }
  func.func @transform_2(%arg0: i32, %arg1: i32) -> (i32, i32, i32) {
    %c0_i32 = arith.constant 0 : i32
    %c0_i32_0 = arith.constant 0 : i32
    %c0_i32_1 = arith.constant 0 : i32
    return %arg1, %c0_i32, %c0_i32_0 : i32, i32, i32
  }
  func.func @transform_3(%arg0: i32, %arg1: i32) -> (i32, i32, i32, i32) {
    %c0_i32 = arith.constant 0 : i32
    %c0_i32_0 = arith.constant 0 : i32
    %c0_i32_1 = arith.constant 0 : i32
    %c0_i32_2 = arith.constant 0 : i32
    return %arg1, %c0_i32, %c0_i32_0, %c0_i32_1 : i32, i32, i32, i32
  }
  func.func @transform_4(%arg0: i32, %arg1: i32) -> (i32, i32, i32, i32) {
    %c0_i32 = arith.constant 0 : i32
    %c0_i32_0 = arith.constant 0 : i32
    %c0_i32_1 = arith.constant 0 : i32
    %c0_i32_2 = arith.constant 0 : i32
    return %arg1, %c0_i32, %c0_i32_0, %c0_i32_1 : i32, i32, i32, i32
  }
  func.func @transform_5(%arg0: i32, %arg1: i32) -> (i32, i32, i32, i32) {
    %c0_i32 = arith.constant 0 : i32
    %c0_i32_0 = arith.constant 0 : i32
    %c0_i32_1 = arith.constant 0 : i32
    %c0_i32_2 = arith.constant 0 : i32
    return %arg1, %c0_i32, %c0_i32_0, %c0_i32_1 : i32, i32, i32, i32
  }
  func.func @transform_6(%arg0: i32, %arg1: i32) -> (i32, i32, i32) {
    %c0_i32 = arith.constant 0 : i32
    %c0_i32_0 = arith.constant 0 : i32
    %c0_i32_1 = arith.constant 0 : i32
    return %arg1, %c0_i32, %c0_i32_0 : i32, i32, i32
  }
  func.func @transform_7(%arg0: i32, %arg1: i32) -> (i32, i32, i32) {
    %c0_i32 = arith.constant 0 : i32
    %c0_i32_0 = arith.constant 0 : i32
    %c0_i32_1 = arith.constant 0 : i32
    return %arg1, %c0_i32, %c0_i32_0 : i32, i32, i32
  }
  func.func @transform_8(%arg0: i32, %arg1: i32) -> (i32, i32, i32) {
    %c0_i32 = arith.constant 0 : i32
    %c0_i32_0 = arith.constant 0 : i32
    %c0_i32_1 = arith.constant 0 : i32
    return %arg1, %c0_i32, %c0_i32_0 : i32, i32, i32
  }
  func.func @transform_9(%arg0: i32, %arg1: i32) -> (i32, i32, i32) {
    %c0_i32 = arith.constant 0 : i32
    %c0_i32_0 = arith.constant 0 : i32
    %c0_i32_1 = arith.constant 0 : i32
    return %arg1, %c0_i32, %c0_i32_0 : i32, i32, i32
  }
  func.func @transform_10(%arg0: i32, %arg1: i32) -> (i32, i32, i32) {
    %c0_i32 = arith.constant 0 : i32
    %c0_i32_0 = arith.constant 0 : i32
    %c0_i32_1 = arith.constant 0 : i32
    return %arg1, %c0_i32, %c0_i32_0 : i32, i32, i32
  }
  func.func @transform_11(%arg0: i32, %arg1: i32) -> (i32, i32, i32) {
    %c0_i32 = arith.constant 0 : i32
    %c0_i32_0 = arith.constant 0 : i32
    %c0_i32_1 = arith.constant 0 : i32
    return %arg1, %c0_i32, %c0_i32_0 : i32, i32, i32
  }
  func.func @transform_12(%arg0: i32, %arg1: i32) -> (i32, i32, i32) {
    %c0_i32 = arith.constant 0 : i32
    %c0_i32_0 = arith.constant 0 : i32
    %c0_i32_1 = arith.constant 0 : i32
    return %arg1, %c0_i32, %c0_i32_0 : i32, i32, i32
  }
  func.func @transform_13(%arg0: i32, %arg1: i32) -> (i32, i32, i32) {
    %c0_i32 = arith.constant 0 : i32
    %c0_i32_0 = arith.constant 0 : i32
    %c0_i32_1 = arith.constant 0 : i32
    return %arg1, %c0_i32, %c0_i32_0 : i32, i32, i32
  }
  func.func @transform_14(%arg0: i32, %arg1: i32) -> (i32, i32, i32) {
    %c0_i32 = arith.constant 0 : i32
    %c0_i32_0 = arith.constant 0 : i32
    %c0_i32_1 = arith.constant 0 : i32
    return %arg0, %c0_i32, %c0_i32_0 : i32, i32, i32
  }
}

</mosaic_0001>

<bundles_post_ra>
// kernel: transformer_forward.1
= control target key start
LH: loop header
LB: loop body
LE: loop exit
PB: predicated region body
PF: predicated region fallthrough
CT: control target
= control target key end

     0   :  { %s3423_s0 = inlined_call_operand.vmem [shape: f32[2,8,32], index: 0, kind: input, shape index: {}]   ;;  %s3424_s1 = inlined_call_operand.vmem [shape: f32[2,1,32], index: 1, kind: input, shape index: {}]   ;;  %s3425_s2 = inlined_call_operand.vmem [shape: f32[2,1,32], index: 2, kind: input, shape index: {}]   ;;  %s3426_s3 = inlined_call_operand.vmem [shape: bf16[2,4,32,8], index: 3, kind: input, shape index: {}]   ;;  %s3427_s4 = inlined_call_operand.vmem [shape: bf16[2,4,32,8], index: 4, kind: input, shape index: {}]   ;;  %s3428_s5 = inlined_call_operand.vmem [shape: bf16[2,4,32,8], index: 5, kind: input, shape index: {}]   ;;  %s3429_s6 = inlined_call_operand.vmem [shape: bf16[2,32,32], index: 6, kind: input, shape index: {}]   ;;  %s3430_s7 = inlined_call_operand.vmem [shape: f32[2,1,32], index: 7, kind: input, shape index: {}]   ;;  %s3431_s8 = inlined_call_operand.vmem [shape: f32[2,1,32], index: 8, kind: input, shape index: {}]   ;;  %s3432_s9 = inlined_call_operand.vmem [shape: f32[2,1,32], index: 9, kind: input, shape index: {}]   ;;  %s3433_s10 = inlined_call_operand.vmem [shape: bf16[2,32,64], index: 10, kind: input, shape index: {}]   ;;  %s3434_s11 = inlined_call_operand.vmem [shape: f32[2,1,64], index: 11, kind: input, shape index: {}]   ;;  %s3435_s12 = inlined_call_operand.vmem [shape: bf16[2,64,32], index: 12, kind: input, shape index: {}]   ;;  %s3436_s13 = inlined_call_operand.vmem [shape: f32[2,1,32], index: 13, kind: input, shape index: {}]   ;;  %s3437_s14 = inlined_call_operand.hbm [shape: f32[2,8,32], index: 14, kind: output, shape index: {}]  }
   0x1   :  { %3454 = sst [smem:[#allocation19_spill]] %s3423_s0 }
   0x2   :  { %3455 = sst [smem:[#allocation20_spill]] %s3426_s3 }
   0x3   :  { %3456 = sst [smem:[#allocation21_spill]] %s3427_s4 }
   0x4   :  { %3457 = sst [smem:[#allocation22_spill]] %s3428_s5 }
   0x5   :  { %3458 = sst [smem:[#allocation23_spill]] %s3429_s6 }
   0x6   :  { %3459 = sst [smem:[#allocation24_spill]] %s3431_s8 }
   0x7   :  { %3460 = sst [smem:[#allocation25_spill]] %s3435_s12 }
   0x8   :  { %3461 = sst [smem:[#allocation26_spill]] %s3437_s14 }
   0x9   :  { %19 = vsyncpa [#allocation3], 0 }
   0xa   :  { %21 = vsyncpa [#allocation3 + $0x1], 0  ;;  %s2989_s29 = smov 0   ;;  %s2991_s30 = smov 0  }
   0xb   :  { %s2993_s15 = smov 0   ;;  %s2995_s16 = smov 0  }
   0xc   :  { %s2997_s17 = smov 0   ;;  %s2999_s18 = smov 0  }
   0xd   :  { %s3001_s19 = smov 0   ;;  %s3003_s20 = smov 0  }
   0xe LB: > { %3462 = sst [smem:[#allocation5_spill]] %s2877_s29  ;;  %s2353_s21 = sadd.s32 4294967295, %s2905_s20   ;;  %s2905_s20 = sphi %s3003_s20, %s27_s20   ;;  %s2901_s19 = sphi %s3001_s19, %s3506_s19   ;;  %s2897_s18 = sphi %s2999_s18, %s3505_s18   ;;  %s2893_s17 = sphi %s2997_s17, %s3504_s17   ;;  %s2889_s16 = sphi %s2995_s16, %s3503_s16   ;;  %s2885_s15 = sphi %s2993_s15, %s3502_s15   ;;  %s2881_s30 = sphi %s2991_s30, %s3501_s30   ;;  %s2877_s29 = sphi %s2989_s29, %s3500_s29  }
   0xf   : > { %3463 = sst [smem:[#allocation6_spill]] %s2881_s30  ;;  %s2354_s22 = sadd.s32 4294967294, %s2905_s20  }
  0x10   : > { %3464 = sst [smem:[#allocation7_spill]] %s2885_s15  ;;  %s36_s23 = sadd.s32 1, %s2897_s18 }
  0x11   : > { %3465 = sst [smem:[#allocation8_spill]] %s2889_s16  ;;  %p37_p0 = scmp.ge.s32.totalorder %s36_s23, 2 }
  0x12   : > { %3466 = sst [smem:[#allocation9_spill]] %s2893_s17  ;;  %s39_s24 = sadd.s32 1, %s2901_s19 }
  0x13   : > { %3467 = sst [smem:[#allocation10_spill]] %s2897_s18  ;;  %p420_p1 = scmp.ne.s32.totalorder %s2885_s15, %s2881_s30 }
  0x14   : > { %3468 = sst [smem:[#allocation11_spill]] %s2901_s19  ;;  %p421_p2 = scmp.eq.s32.totalorder %s2353_s21, 3 }
  0x15   : > { %3469 = sst [smem:[#allocation12_spill]] %s2905_s20  ;;  %s3508_s23 = smov (%p37_p0, %s36_s23), 0 }
  0x16   : > { %3470 = sst [smem:[#allocation13_spill]] %s3508_s23  ;;  %s3510_s24 = smov (!%p37_p0, %s39_s24), %s2901_s19 }
  0x17   : > { %p3038_p3 = por %p421_p2, %p420_p1  ;;  %p426_p4 = scmp.ne.s32.totalorder %s2881_s30, %s2877_s29 }
  0x18   : > { %p41_p5 = scmp.ge.s32.totalorder %s3510_s24, 2  ;;  %p427_p6 = scmp.eq.s32.totalorder %s2354_s22, 3 }
  0x19   : > { %s3471_s25 = scalar_select %p3038_p3, 1, 0 }
  0x1a   : > { %p2357_p7 = scmp.ge.s32.totalorder %s2905_s20, 1  ;;  %p542_p8 = scmp.lt.s32.totalorder %s2905_s20, 5 }
  0x1b   : > { %3472 = sst [smem:[#allocation14_spill]] %s3471_s25  ;;  %s3512_s24 = smov (%p41_p5, %s3510_s24), 0 }
  0x1c   : > { %3473 = sst [smem:[#allocation15_spill]] %s3512_s24  ;;  %p3048_p9 = por %p427_p6, %p426_p4 }
  0x1d   : > { %p543_p10 = pnand %p2357_p7, %p542_p8  ;;  %s407_s27 = ssub.s32 %s2901_s19, %s3512_s24 }
  0x1e   : > { %s3474_s26 = scalar_select %p3048_p9, 1, 0 }
  0x1f   : > { %s410_s28 = sadd.s32 1, %s2885_s15  ;;  %p408_p11 = scmp.eq.s32.totalorder %s407_s27, 0 }
  0x20   : > { %3475 = sst [smem:[#allocation16_spill]] %s3474_s26  ;;  %546 = sbr.rel (%p543_p10) target bundleno = 4528 (0x11b0), region = 76 }
  0x21   : > { %s3056_s21 = scalar_select %p408_p11, %s2885_s15, %s410_s28  }
  0x23   : > { %3476 = sst [smem:[#allocation17_spill]] %s3056_s21 }
  0x25   : > { %s3442_s22 = sand.u32 1, %s2881_s30   ;;  %p638_p12 = scmp.lt.s32.totalorder %s2893_s17, 1 }
  0x26   : > { %s2358_s23 = sshll.u32 %s3442_s22, 3  ;;  %p642_p13 = scmp.lt.s32.totalorder %s2889_s16, 1 }
  0x27   : > { %s639_s18 = scalar_select %p638_p12, %s2893_s17, 1 }
  0x28   : > { %s3065_s26 = scalar_select %p642_p13, %s2889_s16, 1 }
  0x29   : > { %s2359_s27 = sshll.u32 %s639_s18, 3  ;;  %s3477_s0 = sld [smem:[#allocation19_spill]] }
  0x2a   : > { %s2439_s25 = sshll.u32 %s3065_s26, 6  ;;  %s3478_s3 = sld [smem:[#allocation20_spill]] }
  0x2b   : > { %s3479_s4 = sld [smem:[#allocation21_spill]]  ;;  %s2442_s22 = sshll.u32 %s3065_s26, 4 }
  0x2c   : > { %s3480_s5 = sld [smem:[#allocation22_spill]]  ;;  %s692_s17 = scalar_lea.vmem %s3436_s13, %s3065_s26 }
  0x2d   : > { %s3481_s6 = sld [smem:[#allocation23_spill]] }
  0x2e   : > { %s3484_s12 = sld [smem:[#allocation25_spill]] }
  0x2f   : > { %s641_s19 = scalar_lea.vmem %s3477_s0, %s2359_s27  ;;  %s676_s27 = scalar_lea.vmem %s3432_s9, %s3065_s26 }
  0x30   : > { %s3082_s16 = scalar_lea.vmem %s3478_s3, %s2439_s25  ;;  %s3485_s18 = sld [smem:[#allocation8_spill]] }
  0x31   : > { %s3087_s24 = scalar_lea.vmem %s3479_s4, %s2439_s25  ;;  %s3131_s4 = scalar_lea.vmem [#allocation2], %s2358_s23 }
  0x32   : > { %s3092_s21 = scalar_lea.vmem %s3480_s5, %s2439_s25  ;;  %s3115_s5 = scalar_lea.vmem %s3433_s10, %s2442_s22 }
  0x33   : > { %s3098_s20 = scalar_lea.vmem %s3481_s6, %s2442_s22  ;;  %s684_s6 = scalar_lea.vmem %s3434_s11, %s3065_s26 }
  0x34   : > { %3482 = sst [smem:[#allocation18_spill]] %s3098_s20  ;;  %s2444_s20 = sshll.u32 %s3065_s26, 5 }
  0x35   : > { %s3129_s8 = scalar_lea.vmem %s3484_s12, %s2444_s20 }
  0x36   : > { %p2372_p0 = scmp.ne.s32.totalorder %s3485_s18, 0 }
  0x38   : > { %697 = sbr.rel (%p2372_p0) target bundleno = 63 (0x3f), region = 80 }
  0x3d   : > { %v698_v0 = vld [vmem:[%s641_s19] sm:$0xff]  ;;  %vm699_vm0 = vcmask 261120  }
  0x3e   : > { %700 = vst.msk [vmem:[%s3131_s4] sm:$0xff] %vm699_vm0, %v698_v0 }
  0x3f PF: > { %vm704_vm1 = vcmask 261120   ;;  %v2757_v8 = vld [vmem:[%s3082_s16 + $0x8] sm:$0xff]   ;;  %v2907_v10 = vmov 0.0   ;;  %v2759_v11 = vld [vmem:[%s3082_s16] sm:$0xff]   ;;  %vm2908_vm2 = vmmov 0   ;;  %s3486_s22 = scalar_lea.vmem %s3424_s1, %s3065_s26  ;;  %s3487_s25 = scalar_lea.vmem %s3425_s2, %s3065_s26  ;;  %vm1006_vm3 = vcmask 1043456  }
  0x40   : > { %v2758_v9 = vld [vmem:[%s3092_s21 + $0x8] sm:$0xff]   ;;  %2508 = vmatprep.subr.bf16.mxu1 %v2907_v10  ;;  %2524 = vmatprep.subr.bf16.mxu0 %v2907_v10  ;;  %v2760_v12 = vld [vmem:[%s3092_s21] sm:$0xff]   ;;  %vm943_vm4 = vcmask 64512   ;;  %v2763_v41 = vld [vmem:[%s3082_s16 + $0x18] sm:$0xff]   ;;  %s2911_s28 = smov 24   ;;  %vm1852_vm5 = vcmask 130048   ;;  %s3489_s14 = scalar_lea.vmem %s3430_s7, %s3065_s26 }
  0x41   : > { %2509 = vmatpush3.bf16.msra.mxu1 %v2757_v8  ;;  %2525 = vmatpush3.bf16.msra.mxu0 %v2758_v9  ;;  %v2373_v17 = vld [vmem:[%s3486_s22] ss:$0 sm:$0xff]  ;;  %v2761_v22 = vld [vmem:[%s3087_s24 + $0x8] sm:$0xff]   ;;  %v2764_v43 = vld [vmem:[%s3082_s16 + $0x10] sm:$0xff]   ;;  %vm1854_vm6 = vcmask 195584   ;;  %s3490_s3 = sld [smem:[#allocation24_spill]] }
  0x42   : > { %2510 = vmatprep.subr.bf16.mxu1 %v2907_v10  ;;  %2526 = vmatprep.subr.bf16.mxu0 %v2907_v10  ;;  %v2374_v19 = vld [vmem:[%s3487_s25] ss:$0 sm:$0xff]  ;;  %v2765_v44 = vld [vmem:[%s3092_s21 + $0x18] sm:$0xff]   ;;  %v2766_v45 = vld [vmem:[%s3092_s21 + $0x10] sm:$0xff]   ;;  %vm2088_vm8 = vcmask 523264  }
  0x43   : > { %2512 = vmatprep.mubr.msk.bf16.mxu1 %vm2908_vm2, %v2907_v10  ;;  %2528 = vmatprep.mubr.msk.bf16.mxu0 %vm2908_vm2, %v2907_v10  ;;  %v2762_v24 = vld [vmem:[%s3087_s24] sm:$0xff]   ;;  %v2768_v8 = vld [vmem:[%s3087_s24 + $0x10] sm:$0xff]  }
  0x45   : > { %v3136_v1 = vld [vmem:[%s3131_s4] sm:$0xff]  ;;  %2511 = vmatpush3.bf16.msra.mxu1 %v2759_v11  ;;  %2527 = vmatpush3.bf16.msra.mxu0 %v2760_v12 }
  0x46   : > { %v705_v2 = vsel %vm704_vm1, %v3136_v1, 0.0  ;;  %2516 = vmatprep.subr.bf16.mxu1 %v2907_v10  ;;  %2538 = vmatprep.subr.bf16.mxu0 %v2907_v10 }
  0x47   : > { %706 = vadd.xlane.f32.xlu0 %v705_v2  ;;  %s3491_s18 = scalar_lea.vmem %s3490_s3, %s3065_s26 }
  0xd0   : > { %v707_v3 = vpop.xlane.xlu0 %706 }
  0xd1   : > { %v709_v4 = vmul.f32 0.03125, %v707_v3 }
  0xd3   : > { %v710_v5 = vsub.f32 %v3136_v1, %v709_v4 }
  0xd5   : > { %v711_v6 = vmul.f32 %v710_v5, %v710_v5 }
  0xd7   : > { %v712_v7 = vsel %vm704_vm1, %v711_v6, 0.0  ;;  %v2767_v6 = vld [vmem:[%s3087_s24 + $0x18] sm:$0xff]  }
  0xd8   : > { %713 = vadd.xlane.f32.xlu0 %v712_v7 }
 0x161   : > { %v714_v13 = vpop.xlane.xlu0 %713 }
 0x162   : > { %v715_v14 = vmul.f32 0.03125, %v714_v13 }
 0x164   : > { %v716_v15 = vadd.f32 1e-05, %v715_v14 }
 0x166   : > { %2789 = vrsqrt.f32 %v716_v15 }
 0x173   : > { %v2790_v16 = vpop.eup %2789 }
 0x174   : > { %v718_v18 = vmul.f32 %v2790_v16, %v710_v5 }
 0x176   : > { %v725_v20 = vmul.f32 %v2373_v17, %v718_v18 }
 0x178   : > { %v732_v21 = vadd.f32 %v2374_v19, %v725_v20  ;;  %v2769_v20 = vld [vmem:[%s3082_s16 + $0x28] sm:$0xff]  }
 0x17a   : > { %v3167_v23 = vpack.c.bf16 %v732_v21, %v732_v21 }
 0x17c   : > { %2513 = vmatmul.mubr.msk.bf16.vlgmr.msra.gmra.mxu1 %vm704_vm1, %v3167_v23  ;;  %2529 = vmatmul.mubr.msk.bf16.vlgmr.msra.gmra.mxu0 %vm704_vm1, %v3167_v23 }
 0x17d   : > { %2517 = vmatpush3.bf16.msra.mxu1 %v2761_v22  ;;  %2520 = vmatprep.mubr.msk.bf16.mxu1 %vm2908_vm2, %v2907_v10  ;;  %v2770_v22 = vld [vmem:[%s3082_s16 + $0x20] sm:$0xff]  }
 0x17e   : > { %2518 = vmatprep.subr.bf16.mxu1 %v2907_v10  ;;  %2540 = vmatprep.mubr.msk.bf16.mxu0 %vm2908_vm2, %v2907_v10 }
 0x181   : > { %2519 = vmatpush3.bf16.msra.mxu1 %v2762_v24  ;;  %v2771_v24 = vld [vmem:[%s3092_s21 + $0x28] sm:$0xff]  }
 0x182   : > { %2532 = vmatprep.subr.bf16.mxu1 %v2907_v10 }
 0x184   : > { %2521 = vmatmul.mubr.msk.bf16.vlgmr.msra.gmra.mxu1 %vm704_vm1, %v3167_v23 }
 0x185   : > { %2534 = vmatprep.mubr.msk.bf16.mxu1 %vm2908_vm2, %v2907_v10 }
 0x23c   : > { %v831_v25 = vpop.f32.mrf.mxu1  ;;  %v935_v26 = vpop.f32.mrf.mxu0 }
 0x23d   : > { %v1002_v27 = vpack.c.bf16 %v935_v26, %v935_v26  ;;  %v941_v42 = vpack.c.bf16 %v831_v25, %v831_v25  ;;  %v2772_v25 = vld [vmem:[%s3092_s21 + $0x20] sm:$0xff]  }
 0x23e   : > { %v2514_v28 = vpop.f32.mrf.mxu1  ;;  %v2530_v29 = vpop.f32.mrf.mxu0 }
 0x23f   : > { %v1008_v30 = vsel %vm1006_vm3, %v1002_v27, 0 }
 0x240   : > { %v834_v31 = vpop.f32.mrf.mxu1  ;;  %v938_v32 = vpop.f32.mrf.mxu0  ;;  %2539 = vmatpush3.bf16.msra.mxu0 %v1008_v30 }
 0x241   : > { %2552 = vmatprep.subr.bf16.mxu0 %v2907_v10 }
 0x242   : > { %v2515_v33 = vpop.f32.mrf.mxu1  ;;  %v2531_v34 = vpop.f32.mrf.mxu0 }
 0x244   : > { %v883_v35 = vpop.f32.mrf.mxu1 }
 0x245   : > { %v942_v36 = vpack.c.bf16 %v883_v35, %v883_v35 }
 0x246   : > { %v2522_v37 = vpop.f32.mrf.mxu1 }
 0x247   : > { %v948_v38 = vsel %vm943_vm4, %v942_v36, 0 }
 0x248   : > { %v886_v39 = vpop.f32.mrf.mxu1  ;;  %2533 = vmatpush3.bf16.xpose.msra.mxu1 %v948_v38 }
 0x249   : > { %2544 = vmatprep.subr.bf16.mxu1 %v2907_v10 }
 0x24a   : > { %v2523_v40 = vpop.f32.mrf.mxu1 }
 0x24f   : > { %2535 = vmatmul.mubr.msk.bf16.vlgmr.msra.gmra.mxu1 %vm943_vm4, %v941_v42 }
 0x250   : > { %2545 = vmatpush3.bf16.msra.mxu1 %v2763_v41  ;;  %2548 = vmatprep.mubr.msk.bf16.mxu1 %vm2908_vm2, %v2907_v10 }
 0x251   : > { %2546 = vmatprep.subr.bf16.mxu1 %v2907_v10 }
 0x254   : > { %2547 = vmatpush3.bf16.msra.mxu1 %v2764_v43 }
 0x255   : > { %2560 = vmatprep.subr.bf16.mxu1 %v2907_v10 }
 0x257   : > { %2549 = vmatmul.mubr.msk.bf16.vlgmr.msra.gmra.mxu1 %vm704_vm1, %v3167_v23 }
 0x258   : > { %2561 = vmatpush3.bf16.msra.mxu1 %v2765_v44  ;;  %2564 = vmatprep.mubr.msk.bf16.mxu1 %vm2908_vm2, %v2907_v10 }
 0x259   : > { %2562 = vmatprep.subr.bf16.mxu1 %v2907_v10 }
 0x25c   : > { %2563 = vmatpush3.bf16.msra.mxu1 %v2766_v45 }
 0x25d   : > { %2574 = vmatprep.subr.bf16.mxu1 %v2907_v10 }
 0x25f   : > { %2565 = vmatmul.mubr.msk.bf16.vlgmr.msra.gmra.mxu1 %vm704_vm1, %v3167_v23 }
 0x260   : > { %2576 = vmatprep.mubr.msk.bf16.mxu1 %vm2908_vm2, %v2907_v10 }
 0x30f   : > { %v984_v46 = vpop.f32.mrf.mxu1 }
 0x310   : > { %v990_v47 = vsel %vm943_vm4, %v984_v46, -inf }
 0x311   : > { %991 = vmax.xlane.f32.xlu1 %v990_v47  ;;  %v2536_v48 = vpop.f32.mrf.mxu1 }
 0x313   : > { %v987_v49 = vpop.f32.mrf.mxu1 }
 0x314   : > { %v2773_v49 = vld [vmem:[%s3087_s24 + $0x28] sm:$0xff]  }
 0x315   : > { %v2537_v50 = vpop.f32.mrf.mxu1 }
 0x317   : > { %v1096_v51 = vpop.f32.mrf.mxu1 }
 0x318   : > { %v1206_v21 = vpack.c.bf16 %v1096_v51, %v1096_v51  ;;  %v2774_v51 = vld [vmem:[%s3087_s24 + $0x20] sm:$0xff]  }
 0x319   : > { %v2550_v52 = vpop.f32.mrf.mxu1 }
 0x31b   : > { %v1099_v53 = vpop.f32.mrf.mxu1 }
 0x31d   : > { %v2551_v54 = vpop.f32.mrf.mxu1 }
 0x31f   : > { %v1200_v55 = vpop.f32.mrf.mxu1 }
 0x320   : > { %v1266_v56 = vpack.c.bf16 %v1200_v55, %v1200_v55 }
 0x321   : > { %v2566_v57 = vpop.f32.mrf.mxu1 }
 0x322   : > { %v1271_v58 = vsel %vm1006_vm3, %v1266_v56, 0 }
 0x323   : > { %v1203_v59 = vpop.f32.mrf.mxu1  ;;  %2575 = vmatpush3.bf16.msra.mxu1 %v1271_v58 }
 0x324   : > { %2588 = vmatprep.subr.bf16.mxu1 %v2907_v10 }
 0x325   : > { %v2567_v60 = vpop.f32.mrf.mxu1 }
 0x39a   : > { %v992_v61 = vpop.xlane.xlu1 %991 }
 0x39b   : > { %v993_v62 = vsub.f32 %v984_v46, %v992_v61 }
 0x39d   : > { %v994_v63 = vmul.f32 1.442695, %v993_v62  ;;  %v2775_v62 = vld [vmem:[%s3082_s16 + $0x38] sm:$0xff]  }
 0x39f   : > { %2791 = vpow2.f32 %v994_v63 }
 0x3ac   : > { %v2792_v0 = vpop.eup %2791 }
 0x3ad   : > { %v996_v2 = vsel %vm943_vm4, %v2792_v0, 0.0 }
 0x3ae   : > { %997 = vadd.xlane.f32.xlu1 %v996_v2  ;;  %v2777_v2 = vld [vmem:[%s3092_s21 + $0x38] sm:$0xff]  }
 0x437   : > { %v998_v3 = vpop.xlane.xlu1 %997 }
 0x438   : > { %2793 = vrcp.f32 %v998_v3  ;;  %v2778_v3 = vld [vmem:[%s3092_s21 + $0x30] sm:$0xff]   ;;  %s2910_s21 = smov 16  }
 0x445   : > { %v2794_v4 = vpop.eup %2793 }
 0x446   : > { %v1000_v5 = vmul.f32 %v2794_v4, %v2792_v0  ;;  %v2776_v0 = vld [vmem:[%s3082_s16 + $0x30] sm:$0xff]   ;;  %s2909_s16 = smov 8  }
 0x448   : > { %v1001_v7 = vpack.c.bf16 %v1000_v5, %v1000_v5 }
 0x44a   : > { %2541 = vmatmul.mubr.msk.bf16.vlgmr.msra.gmra.mxu0 %vm943_vm4, %v1001_v7 }
 0x44b   : > { %2553 = vmatpush3.bf16.msra.mxu0 %v2767_v6  ;;  %2556 = vmatprep.mubr.msk.bf16.mxu0 %vm2908_vm2, %v2907_v10 }
 0x44c   : > { %2554 = vmatprep.subr.bf16.mxu0 %v2907_v10 }
 0x44f   : > { %2555 = vmatpush3.bf16.msra.mxu0 %v2768_v8 }
 0x450   : > { %2568 = vmatprep.subr.bf16.mxu0 %v2907_v10 }
 0x452   : > { %2557 = vmatmul.mubr.msk.bf16.vlgmr.msra.gmra.mxu0 %vm704_vm1, %v3167_v23 }
 0x453   : > { %2570 = vmatprep.mubr.msk.bf16.mxu0 %vm2908_vm2, %v2907_v10 }
 0x50a   : > { %v3222_v9 = vpop.f32.mrf.mxu0 }
 0x50c   : > { %v2542_v11 = vpop.f32.mrf.mxu0 }
 0x50e   : > { %v1047_v12 = vpop.f32.mrf.mxu0 }
 0x510   : > { %v2543_v13 = vpop.f32.mrf.mxu0 }
 0x512   : > { %v1148_v14 = vpop.f32.mrf.mxu0 }
 0x513   : > { %v1207_v15 = vpack.c.bf16 %v1148_v14, %v1148_v14 }
 0x514   : > { %v2558_v16 = vpop.f32.mrf.mxu0 }
 0x515   : > { %v1212_v17 = vsel %vm943_vm4, %v1207_v15, 0 }
 0x516   : > { %v1151_v18 = vpop.f32.mrf.mxu0  ;;  %2569 = vmatpush3.bf16.xpose.msra.mxu0 %v1212_v17 }
 0x517   : > { %2580 = vmatprep.subr.bf16.mxu0 %v2907_v10 }
 0x518   : > { %v2559_v19 = vpop.f32.mrf.mxu0 }
 0x51d   : > { %2571 = vmatmul.mubr.msk.bf16.vlgmr.msra.gmra.mxu0 %vm943_vm4, %v1206_v21 }
 0x51e   : > { %2581 = vmatpush3.bf16.msra.mxu0 %v2769_v20  ;;  %2584 = vmatprep.mubr.msk.bf16.mxu0 %vm2908_vm2, %v2907_v10 }
 0x51f   : > { %2582 = vmatprep.subr.bf16.mxu0 %v2907_v10 }
 0x522   : > { %2583 = vmatpush3.bf16.msra.mxu0 %v2770_v22 }
 0x523   : > { %2596 = vmatprep.subr.bf16.mxu0 %v2907_v10 }
 0x525   : > { %2585 = vmatmul.mubr.msk.bf16.vlgmr.msra.gmra.mxu0 %vm704_vm1, %v3167_v23 }
 0x526   : > { %2597 = vmatpush3.bf16.msra.mxu0 %v2771_v24  ;;  %2600 = vmatprep.mubr.msk.bf16.mxu0 %vm2908_vm2, %v2907_v10 }
 0x527   : > { %2598 = vmatprep.subr.bf16.mxu0 %v2907_v10 }
 0x52a   : > { %2599 = vmatpush3.bf16.msra.mxu0 %v2772_v25 }
 0x52b   : > { %2610 = vmatprep.subr.bf16.mxu0 %v2907_v10 }
 0x52d   : > { %2601 = vmatmul.mubr.msk.bf16.vlgmr.msra.gmra.mxu0 %vm704_vm1, %v3167_v23 }
 0x52e   : > { %2612 = vmatprep.mubr.msk.bf16.mxu0 %vm2908_vm2, %v2907_v10 }
 0x5dd   : > { %v1248_v26 = vpop.f32.mrf.mxu0 }
 0x5de   : > { %v1254_v27 = vsel %vm943_vm4, %v1248_v26, -inf }
 0x5df   : > { %1255 = vmax.xlane.f32.xlu0 %v1254_v27  ;;  %v2572_v28 = vpop.f32.mrf.mxu0 }
 0x5e1   : > { %v1251_v29 = vpop.f32.mrf.mxu0 }
 0x5e3   : > { %v2573_v30 = vpop.f32.mrf.mxu0 }
 0x5e4   : > { %v2779_v30 = vld [vmem:[%s3087_s24 + $0x38] sm:$0xff]  }
 0x5e5   : > { %v1359_v31 = vpop.f32.mrf.mxu0 }
 0x5e6   : > { %v1469_v63 = vpack.c.bf16 %v1359_v31, %v1359_v31 }
 0x5e7   : > { %v2586_v32 = vpop.f32.mrf.mxu0 }
 0x5e8   : > { %v2780_v32 = vld [vmem:[%s3087_s24 + $0x30] sm:$0xff]   ;;  %s3488_s24 = sld [smem:[#allocation18_spill]] }
 0x5e9   : > { %v1362_v33 = vpop.f32.mrf.mxu0 }
 0x5eb   : > { %v2587_v34 = vpop.f32.mrf.mxu0 }
 0x5ed   : > { %v1463_v35 = vpop.f32.mrf.mxu0 }
 0x5ee   : > { %v1529_v36 = vpack.c.bf16 %v1463_v35, %v1463_v35 }
 0x5ef   : > { %v2602_v37 = vpop.f32.mrf.mxu0 }
 0x5f0   : > { %v1534_v38 = vsel %vm1006_vm3, %v1529_v36, 0 }
 0x5f1   : > { %v1466_v39 = vpop.f32.mrf.mxu0  ;;  %2611 = vmatpush3.bf16.msra.mxu0 %v1534_v38 }
 0x5f2   : > { %2624 = vmatprep.subr.bf16.mxu0 %v2907_v10 }
 0x5f3   : > { %v2603_v40 = vpop.f32.mrf.mxu0 }
 0x668   : > { %v1256_v41 = vpop.xlane.xlu0 %1255 }
 0x669   : > { %v1257_v42 = vsub.f32 %v1248_v26, %v1256_v41 }
 0x66b   : > { %v1258_v43 = vmul.f32 1.442695, %v1257_v42 }
 0x66d   : > { %2795 = vpow2.f32 %v1258_v43 }
 0x67a   : > { %v2796_v44 = vpop.eup %2795 }
 0x67b   : > { %v1260_v45 = vsel %vm943_vm4, %v2796_v44, 0.0 }
 0x67c   : > { %1261 = vadd.xlane.f32.xlu1 %v1260_v45 }
 0x705   : > { %v1262_v46 = vpop.xlane.xlu1 %1261 }
 0x706   : > { %2797 = vrcp.f32 %v1262_v46 }
 0x713   : > { %v2798_v47 = vpop.eup %2797 }
 0x714   : > { %v1264_v48 = vmul.f32 %v2798_v47, %v2796_v44 }
 0x716   : > { %v1265_v50 = vpack.c.bf16 %v1264_v48, %v1264_v48 }
 0x718   : > { %2577 = vmatmul.mubr.msk.bf16.vlgmr.msra.gmra.mxu1 %vm943_vm4, %v1265_v50 }
 0x719   : > { %2589 = vmatpush3.bf16.msra.mxu1 %v2773_v49  ;;  %2592 = vmatprep.mubr.msk.bf16.mxu1 %vm2908_vm2, %v2907_v10 }
 0x71a   : > { %2590 = vmatprep.subr.bf16.mxu1 %v2907_v10 }
 0x71d   : > { %2591 = vmatpush3.bf16.msra.mxu1 %v2774_v51 }
 0x71e   : > { %2604 = vmatprep.subr.bf16.mxu1 %v2907_v10 }
 0x720   : > { %2593 = vmatmul.mubr.msk.bf16.vlgmr.msra.gmra.mxu1 %vm704_vm1, %v3167_v23 }
 0x721   : > { %2606 = vmatprep.mubr.msk.bf16.mxu1 %vm2908_vm2, %v2907_v10 }
 0x7d8   : > { %v3260_v52 = vpop.f32.mrf.mxu1 }
 0x7da   : > { %v2578_v53 = vpop.f32.mrf.mxu1 }
 0x7dc   : > { %v1310_v54 = vpop.f32.mrf.mxu1 }
 0x7de   : > { %v2579_v55 = vpop.f32.mrf.mxu1 }
 0x7e0   : > { %v1411_v56 = vpop.f32.mrf.mxu1 }
 0x7e1   : > { %v1470_v57 = vpack.c.bf16 %v1411_v56, %v1411_v56 }
 0x7e2   : > { %v2594_v58 = vpop.f32.mrf.mxu1 }
 0x7e3   : > { %v1475_v59 = vsel %vm943_vm4, %v1470_v57, 0  ;;  %v2782_v58 = vld [vmem:[%s3488_s24] sm:$0xff]  }
 0x7e4   : > { %v1414_v60 = vpop.f32.mrf.mxu1  ;;  %2605 = vmatpush3.bf16.xpose.msra.mxu1 %v1475_v59 }
 0x7e5   : > { %2616 = vmatprep.subr.bf16.mxu1 %v2907_v10 }
 0x7e6   : > { %v2595_v61 = vpop.f32.mrf.mxu1 }
 0x7eb   : > { %2607 = vmatmul.mubr.msk.bf16.vlgmr.msra.gmra.mxu1 %vm943_vm4, %v1469_v63 }
 0x7ec   : > { %2617 = vmatpush3.bf16.msra.mxu1 %v2775_v62  ;;  %2620 = vmatprep.mubr.msk.bf16.mxu1 %vm2908_vm2, %v2907_v10 }
 0x7ed   : > { %2618 = vmatprep.subr.bf16.mxu1 %v2907_v10 }
 0x7f0   : > { %2619 = vmatpush3.bf16.msra.mxu1 %v2776_v0 }
 0x7f1   : > { %2632 = vmatprep.subr.bf16.mxu1 %v2907_v10 }
 0x7f3   : > { %2621 = vmatmul.mubr.msk.bf16.vlgmr.msra.gmra.mxu1 %vm704_vm1, %v3167_v23 }
 0x7f4   : > { %2633 = vmatpush3.bf16.msra.mxu1 %v2777_v2  ;;  %2636 = vmatprep.mubr.msk.bf16.mxu1 %vm2908_vm2, %v2907_v10 }
 0x7f5   : > { %2634 = vmatprep.subr.bf16.mxu1 %v2907_v10 }
 0x7f8   : > { %2635 = vmatpush3.bf16.msra.mxu1 %v2778_v3 }
 0x7f9   : > { %2646 = vmatprep.subr.bf16.mxu1 %v2907_v10 }
 0x7fb   : > { %2637 = vmatmul.mubr.msk.bf16.vlgmr.msra.gmra.mxu1 %vm704_vm1, %v3167_v23 }
 0x7fc   : > { %2648 = vmatprep.mubr.msk.bf16.mxu1 %vm2908_vm2, %v2907_v10 }
 0x8ab   : > { %v1511_v4 = vpop.f32.mrf.mxu1 }
 0x8ac   : > { %v1517_v5 = vsel %vm943_vm4, %v1511_v4, -inf }
 0x8ad   : > { %1518 = vmax.xlane.f32.xlu0 %v1517_v5  ;;  %v2608_v6 = vpop.f32.mrf.mxu1 }
 0x8af   : > { %v1514_v7 = vpop.f32.mrf.mxu1 }
 0x8b1   : > { %v2609_v8 = vpop.f32.mrf.mxu1 }
 0x8b2   : > { %v2422_v8 = vld [vmem:[%s3489_s14] ss:$0 sm:$0xff]  ;;  %s2913_s14 = smov [#allocation2]  }
 0x8b3   : > { %v1622_v11 = vpop.f32.mrf.mxu1  ;;  %s2817_s30 = sshll.u32 %s2913_s14, 4  ;;  %s2818_s30 = int_to_ptr.vmem [resolvable:$false] %s2817_s30 }
 0x8b4   : > { %v1732_v43 = vpack.c.bf16 %v1622_v11, %v1622_v11  ;;  %s2819_s0 = scalar_lea.vmem %s2818_s30, 256 }
 0x8b5   : > { %v2622_v12 = vpop.f32.mrf.mxu1 }
 0x8b7   : > { %v1625_v13 = vpop.f32.mrf.mxu1 }
 0x8b9   : > { %v2623_v14 = vpop.f32.mrf.mxu1 }
 0x8bb   : > { %v1726_v15 = vpop.f32.mrf.mxu1 }
 0x8bc   : > { %v1792_v16 = vpack.c.bf16 %v1726_v15, %v1726_v15 }
 0x8bd   : > { %v2638_v17 = vpop.f32.mrf.mxu1 }
 0x8be   : > { %v1797_v18 = vsel %vm1006_vm3, %v1792_v16, 0 }
 0x8bf   : > { %v1729_v19 = vpop.f32.mrf.mxu1  ;;  %2647 = vmatpush3.bf16.msra.mxu1 %v1797_v18 }
 0x8c0   : > { %2660 = vmatprep.subr.bf16.mxu1 %v2907_v10 }
 0x8c1   : > { %v2639_v20 = vpop.f32.mrf.mxu1 }
 0x936   : > { %v1519_v21 = vpop.xlane.xlu0 %1518 }
 0x937   : > { %v1520_v22 = vsub.f32 %v1511_v4, %v1519_v21  ;;  %v2784_v21 = vld [vmem:[%s3115_s5] sm:$0xff]  }
 0x939   : > { %v1521_v24 = vmul.f32 1.442695, %v1520_v22 }
 0x93b   : > { %2799 = vpow2.f32 %v1521_v24 }
 0x948   : > { %v2800_v25 = vpop.eup %2799 }
 0x949   : > { %v1523_v26 = vsel %vm943_vm4, %v2800_v25, 0.0 }
 0x94a   : > { %1524 = vadd.xlane.f32.xlu1 %v1523_v26 }
 0x9d3   : > { %v1525_v27 = vpop.xlane.xlu1 %1524 }
 0x9d4   : > { %2801 = vrcp.f32 %v1525_v27  ;;  %v2423_v27 = vld [vmem:[%s3491_s18] ss:$0 sm:$0xff] }
 0x9e1   : > { %v2802_v28 = vpop.eup %2801 }
 0x9e2   : > { %v1527_v29 = vmul.f32 %v2802_v28, %v2800_v25 }
 0x9e4   : > { %v1528_v31 = vpack.c.bf16 %v1527_v29, %v1527_v29  ;;  %v2424_v29 = vld [vmem:[%s676_s27] ss:$0 sm:$0xff] }
 0x9e6   : > { %2613 = vmatmul.mubr.msk.bf16.vlgmr.msra.gmra.mxu0 %vm943_vm4, %v1528_v31 }
 0x9e7   : > { %2625 = vmatpush3.bf16.msra.mxu0 %v2779_v30  ;;  %2628 = vmatprep.mubr.msk.bf16.mxu0 %vm2908_vm2, %v2907_v10 }
 0x9e8   : > { %2626 = vmatprep.subr.bf16.mxu0 %v2907_v10 }
 0x9eb   : > { %2627 = vmatpush3.bf16.msra.mxu0 %v2780_v32 }
 0x9ec   : > { %2640 = vmatprep.subr.bf16.mxu0 %v2907_v10 }
 0x9ee   : > { %2629 = vmatmul.mubr.msk.bf16.vlgmr.msra.gmra.mxu0 %vm704_vm1, %v3167_v23 }
 0x9ef   : > { %2642 = vmatprep.mubr.msk.bf16.mxu0 %vm2908_vm2, %v2907_v10 }
 0xaa6   : > { %v1570_v33 = vpop.f32.mrf.mxu0 }
 0xaa8   : > { %v2614_v34 = vpop.f32.mrf.mxu0 }
 0xaa9   : > { %v2786_v34 = vld [vmem:[%s3129_s8 + $0x10] sm:$0xff]  }
 0xaaa   : > { %v1573_v35 = vpop.f32.mrf.mxu0 }
 0xaab   : > { %v2787_v35 = vld [vmem:[%s3129_s8 + $0x8] sm:$0xff]  }
 0xaac   : > { %v2615_v36 = vpop.f32.mrf.mxu0 }
 0xaad   : > { %v2788_v36 = vld [vmem:[%s3129_s8] sm:$0xff]  }
 0xaae   : > { %v1674_v37 = vpop.f32.mrf.mxu0 }
 0xaaf   : > { %v1733_v38 = vpack.c.bf16 %v1674_v37, %v1674_v37  ;;  %v2425_v37 = vld [vmem:[%s684_s6] ss:$0 sm:$0xff]  ;;  %s3492_s6 = sld [smem:[#allocation9_spill]] }
 0xab0   : > { %v2630_v39 = vpop.f32.mrf.mxu0 }
 0xab1   : > { %v1738_v40 = vsel %vm943_vm4, %v1733_v38, 0 }
 0xab2   : > { %v1677_v41 = vpop.f32.mrf.mxu0  ;;  %2641 = vmatpush3.bf16.xpose.msra.mxu0 %v1738_v40 }
 0xab3   : > { %2652 = vmatprep.subr.bf16.mxu0 %v2907_v10 }
 0xab4   : > { %v2631_v42 = vpop.f32.mrf.mxu0 }
 0xab5   : > { %s2436_s25 = sshll.u32 %s3492_s6, 7 }
 0xab9   : > { %2643 = vmatmul.mubr.msk.bf16.vlgmr.msra.gmra.mxu0 %vm943_vm4, %v1732_v43 }
 0xaba   : > { %2656 = vmatprep.mubr.msk.bf16.mxu0 %vm2908_vm2, %v2907_v10 }
 0xb79   : > { %v1774_v23 = vpop.f32.mrf.mxu0 }
 0xb7a   : > { %v1780_v44 = vsel %vm943_vm4, %v1774_v23, -inf }
 0xb7b   : > { %1781 = vmax.xlane.f32.xlu0 %v1780_v44  ;;  %v2644_v45 = vpop.f32.mrf.mxu0 }
 0xb7d   : > { %v1777_v46 = vpop.f32.mrf.mxu0 }
 0xb7f   : > { %v2645_v47 = vpop.f32.mrf.mxu0 }
 0xb91   : > { %1840 = vrot.lane.b32.xlu0 %v3260_v52, %s2909_s16  ;;  %v2781_v52 = vld [vmem:[%s3488_s24 + $0x8] sm:$0xff]   ;;  %s2148_s16 = sshll.u32 %s3131_s4, 4  ;;  %s3369_s16 = int_to_ptr.vmem [resolvable:$true] %s2148_s16 }
 0xb92   : > { %2653 = vmatpush3.bf16.msra.mxu0 %v2781_v52  ;;  %s2813_s29 = scalar_lea.vmem %s3369_s16, 128  ;;  %p2820_p5 = scmp.lt.s32.totalorder %s3369_s16, %s2818_s30 }
 0xb93   : > { %2654 = vmatprep.subr.bf16.mxu0 %v2907_v10  ;;  %p2814_p1 = scmp.ne.s32.totalorder %s3369_s16, %s2813_s29  ;;  %p2821_p6 = scmp.lt.s32.totalorder %s2819_s0, %s2813_s29 }
 0xb95   : > { %p2815_p2 = pnand %p2814_p1, %p3038_p3  ;;  %p2822_p7 = por %p2821_p6, %p2820_p5 }
 0xb96   : > { %2655 = vmatpush3.bf16.msra.mxu0 %v2782_v58 }
 0xb97   : > { %2668 = vmatprep.subr.bf16.mxu0 %v2907_v10  ;;  %p2816_p4 = pneg %p2815_p2 }
 0xb99   : > { %p2823_p8 = pnand %p2822_p7, %p2816_p4 }
 0xc04   : > { %v1782_v48 = vpop.xlane.xlu0 %1781 }
 0xc05   : > { %v1783_v49 = vsub.f32 %v1774_v23, %v1782_v48 }
 0xc07   : > { %v1784_v50 = vmul.f32 1.442695, %v1783_v49 }
 0xc08   : > { %v1841_v63 = vpop.permute.xlu0 %1840 }
 0xc09   : > { %2803 = vpow2.f32 %v1784_v50  ;;  %v1851_v2 = vsel %vm943_vm4, %v3222_v9, %v1841_v63 }
 0xc16   : > { %v2804_v51 = vpop.eup %2803 }
 0xc17   : > { %v1786_v53 = vsel %vm943_vm4, %v2804_v51, 0.0 }
 0xc18   : > { %1787 = vadd.xlane.f32.xlu1 %v1786_v53 }
 0xc29   : > { %1844 = vrot.lane.b32.xlu1 %v1570_v33, %s2910_s21  ;;  %v2785_v33 = vld [vmem:[%s3129_s8 + $0x18] sm:$0xff]   ;;  %s3493_s8 = sld [smem:[#allocation6_spill]] }
 0xc2f   : > { %s3496_s26 = sand.u32 1, %s3493_s8  }
 0xca1   : > { %v1788_v54 = vpop.xlane.xlu1 %1787 }
 0xca2   : > { %2805 = vrcp.f32 %v1788_v54 }
 0xca5   : > { %v1845_v0 = vpop.permute.xlu1 %1844 }
 0xca6   : > { %v1853_v3 = vsel %vm1852_vm5, %v1851_v2, %v1845_v0 }
 0xcaf   : > { %v2806_v55 = vpop.eup %2805 }
 0xcb0   : > { %v1790_v56 = vmul.f32 %v2806_v55, %v2804_v51 }
 0xcb2   : > { %v1791_v57 = vpack.c.bf16 %v1790_v56, %v1790_v56 }
 0xcb4   : > { %2649 = vmatmul.mubr.msk.bf16.vlgmr.msra.gmra.mxu1 %vm943_vm4, %v1791_v57 }
 0xcb5   : > { %2664 = vmatprep.mubr.msk.bf16.mxu1 %vm2908_vm2, %v2907_v10 }
 0xd74   : > { %v1833_v59 = vpop.f32.mrf.mxu1 }
 0xd75   : > { %1848 = vrot.lane.b32.xlu1 %v1833_v59, %s2911_s28  ;;  %s3495_s28 = sld [smem:[#allocation26_spill]] }
 0xd76   : > { %v2650_v60 = vpop.f32.mrf.mxu1 }
 0xd78   : > { %v1836_v61 = vpop.f32.mrf.mxu1 }
 0xd79   : > { %v2912_v61 = vmov -1.0  }
 0xd7a   : > { %v2651_v62 = vpop.f32.mrf.mxu1 }
 0xd7b   : > { %s3367_s15 = scalar_lea.hbm %s3495_s28, %s2436_s25 }
 0xde7   : > { %v1849_v4 = vpop.permute.xlu1 %1848 }
 0xde8   : > { %v1855_v5 = vsel %vm1854_vm6, %v1853_v3, %v1849_v4 }
 0xde9   : > { %v1856_v6 = vpack.c.bf16 %v1855_v5, %v1855_v5  ;;  %v2429_v5 = vld [vmem:[%s692_s17] ss:$0 sm:$0xff]  ;;  %s2135_s17 = scalar_lea.sflag [#allocation3], %s3496_s26 }
 0xdeb   : > { %2657 = vmatmul.mubr.msk.bf16.vlgmr.msra.gmra.mxu0 %vm704_vm1, %v1856_v6 }
 0xdec   : > { %2676 = vmatprep.mubr.msk.bf16.mxu0 %vm2908_vm2, %v2907_v10  ;;  %2669 = vmatpush3.bf16.msra.mxu0 %v2785_v33 }
 0xded   : > { %2670 = vmatprep.subr.bf16.mxu0 %v2907_v10 }
 0xdf0   : > { %2671 = vmatpush3.bf16.msra.mxu0 %v2786_v34 }
 0xdf1   : > { %2672 = vmatprep.subr.bf16.mxu0 %v2907_v10 }
 0xdf4   : > { %2673 = vmatpush3.bf16.msra.mxu0 %v2787_v35 }
 0xdf5   : > { %2674 = vmatprep.subr.bf16.mxu0 %v2907_v10 }
 0xdf8   : > { %2675 = vmatpush3.bf16.msra.mxu0 %v2788_v36 }
 0xeab   : > { %v1910_v7 = vpop.f32.mrf.mxu0 }
 0xeac   : > { %v1916_v11 = vadd.f32 %v1910_v7, %v3136_v1  ;;  %v2783_v1 = vld [vmem:[%s3115_s5 + $0x8] sm:$0xff]  }
 0xead   : > { %v2658_v9 = vpop.f32.mrf.mxu0  ;;  %2661 = vmatpush3.bf16.msra.mxu1 %v2783_v1 }
 0xeae   : > { %v3324_v12 = vadd.f32 %v2422_v8, %v1916_v11  ;;  %2662 = vmatprep.subr.bf16.mxu1 %v2907_v10 }
 0xeaf   : > { %v1913_v13 = vpop.f32.mrf.mxu0 }
 0xeb0   : > { %v1927_v14 = vsel %vm704_vm1, %v3324_v12, 0.0 }
 0xeb1   : > { %1928 = vadd.xlane.f32.xlu1 %v1927_v14  ;;  %v2659_v15 = vpop.f32.mrf.mxu0  ;;  %2663 = vmatpush3.bf16.msra.mxu1 %v2784_v21 }
 0xf3a   : > { %v1929_v16 = vpop.xlane.xlu1 %1928 }
 0xf3b   : > { %v1930_v17 = vmul.f32 0.03125, %v1929_v16 }
 0xf3d   : > { %v1931_v18 = vsub.f32 %v3324_v12, %v1930_v17 }
 0xf3f   : > { %v1932_v19 = vmul.f32 %v1931_v18, %v1931_v18 }
 0xf41   : > { %v1933_v20 = vsel %vm704_vm1, %v1932_v19, 0.0 }
 0xf42   : > { %1934 = vadd.xlane.f32.xlu0 %v1933_v20 }
 0xfcb   : > { %v1935_v22 = vpop.xlane.xlu0 %1934 }
 0xfcc   : > { %v1936_v24 = vmul.f32 0.03125, %v1935_v22 }
 0xfce   : > { %v1937_v25 = vadd.f32 1e-05, %v1936_v24 }
 0xfd0   : > { %2807 = vrsqrt.f32 %v1937_v25 }
 0xfdd   : > { %v2808_v26 = vpop.eup %2807 }
 0xfde   : > { %v1939_v28 = vmul.f32 %v2808_v26, %v1931_v18 }
 0xfe0   : > { %v1946_v30 = vmul.f32 %v2423_v27, %v1939_v28 }
 0xfe2   : > { %v1953_v31 = vadd.f32 %v2424_v29, %v1946_v30 }
 0xfe4   : > { %v1954_v32 = vpack.c.bf16 %v1953_v31, %v1953_v31 }
 0xfe6   : > { %2665 = vmatmul.mubr.msk.bf16.vlgmr.msra.gmra.mxu1 %vm704_vm1, %v1954_v32 }
0x10a6   : > { %v2015_v38 = vpop.f32.mrf.mxu1 }
0x10a7   : > { %v2016_v39 = vadd.f32 %v2425_v37, %v2015_v38 }
0x10a8   : > { %v2666_v40 = vpop.f32.mrf.mxu1 }
0x10a9   : > { %v2022_v41 = vmul.f32 0.70710677, %v2016_v39  ;;  %v2021_v0 = vmul.f32 0.5, %v2016_v39 }
0x10aa   : > { %v2018_v42 = vpop.f32.mrf.mxu1 }
0x10ab   : > { %v2025_v43 = vand.u32 2147483647, %v2022_v41  ;;  %vm2023_vm7 = vcmp.ge.f32.partialorder %v2022_v41, 0.0 }
0x10ac   : > { %v2667_v23 = vpop.f32.mrf.mxu1  ;;  %v2024_v62 = vsel %vm2023_vm7, 1.0, %v2912_v61 }
0x10ad   : > { %v2026_v44 = vmul.f32 0.3275911, %v2025_v43  ;;  %v2039_v46 = vsub.f32 0.0, %v2025_v43 }
0x10af   : > { %v2027_v45 = vadd.f32 1.0, %v2026_v44  ;;  %v2040_v47 = vmul.f32 %v2039_v46, %v2025_v43 }
0x10b1   : > { %2809 = vrcp.f32 %v2027_v45  ;;  %v2041_v49 = vmul.f32 1.442695, %v2040_v47 }
0x10b3   : > { %2811 = vpow2.f32 %v2041_v49 }
0x10be   : > { %v2810_v10 = vpop.eup %2809 }
0x10bf   : > { %v2030_v48 = vmul.f32 1.0614054, %v2810_v10 }
0x10c0   : > { %v2812_v58 = vpop.eup %2811 }
0x10c1   : > { %v2031_v50 = vadd.f32 -1.4531521, %v2030_v48 }
0x10c3   : > { %v2032_v51 = vmul.f32 %v2810_v10, %v2031_v50 }
0x10c5   : > { %v2033_v53 = vadd.f32 1.4214138, %v2032_v51 }
0x10c7   : > { %v2034_v54 = vmul.f32 %v2810_v10, %v2033_v53 }
0x10c9   : > { %v2035_v55 = vadd.f32 -0.28449672, %v2034_v54 }
0x10cb   : > { %v2036_v56 = vmul.f32 %v2810_v10, %v2035_v55 }
0x10cd   : > { %v2037_v57 = vadd.f32 0.2548296, %v2036_v56 }
0x10cf   : > { %v2038_v52 = vmul.f32 %v2810_v10, %v2037_v57 }
0x10d1   : > { %v2043_v59 = vmul.f32 %v2812_v58, %v2038_v52 }
0x10d3   : > { %v2044_v60 = vsub.f32 1.0, %v2043_v59 }
0x10d5   : > { %v2045_v63 = vmul.f32 %v2044_v60, %v2024_v62 }
0x10d7   : > { %v2046_v2 = vadd.f32 1.0, %v2045_v63 }
0x10d9   : > { %v2047_v3 = vmul.f32 %v2046_v2, %v2021_v0 }
0x10db   : > { %v2048_v4 = vpack.c.bf16 %v2047_v3, %v2047_v3 }
0x10dd   : > { %2677 = vmatmul.mubr.msk.bf16.vlgmr.msra.gmra.mxu0 %vm2088_vm8, %v2048_v4 }
0x119d   : > { %v2126_v6 = vpop.f32.mrf.mxu0 }
0x119e   : > { %v2127_v7 = vadd.f32 %v2429_v5, %v2126_v6 }
0x119f   : > { %v2678_v8 = vpop.f32.mrf.mxu0 }
0x11a0   : > { %v2132_v11 = vadd.f32 %v2127_v7, %v3324_v12 }
0x11a1   : > { %v2129_v9 = vpop.f32.mrf.mxu0 }
0x11a2   : > { %2133 = vst.msk [vmem:[%s3131_s4] sm:$0xff] %vm704_vm1, %v2132_v11 }
0x11a3   : > { %v2679_v13 = vpop.f32.mrf.mxu0 }
0x11a4   : > { %2826 = shalt.err (!%p2823_p8)
}
0x11a5   : > { %s2827_s4 = scalar_lea.hbm %s3367_s15, 128  ;;  %s2831_s19 = scalar_lea.hbm %s3495_s28, 256 }
0x11a6   : > { %p2828_p10 = scmp.ne.s32.totalorder %s3367_s15, %s2827_s4  ;;  %p2832_p13 = scmp.lt.s32.totalorder %s3367_s15, %s3495_s28 }
0x11a7   : > { %p2833_p0 = scmp.lt.s32.totalorder %s2831_s19, %s2827_s4 }
0x11a8   : > { %p2829_p11 = pnand %p2828_p10, %p3038_p3 }
0x11a9   : > { %p2834_p1 = por %p2833_p0, %p2832_p13 }
0x11aa   : > { %p2830_p12 = pneg %p2829_p11 }
0x11ac   : > { %p2835_p2 = pnand %p2834_p1, %p2830_p12 }
0x11ae   : > { %2838 = shalt.err (!%p2835_p2)
}
0x11af   : > { %2680 = dma.vmem_to_hbm [thread:$0]  (%p3038_p3), %s3369_s16, 128, %s3367_s15, %s2135_s17  }
0x11b0 PF: > { %s3497_s27 = sld [smem:[#allocation12_spill]] }
0x11b1   : > { %s3498_s6 = sld [smem:[#allocation5_spill]] }
0x11b6   : > { %p2686_p4 = scmp.ge.s32.totalorder %s3497_s27, 2 }
0x11b7   : > { %s2160_s22 = sand.u32 1, %s3498_s6  }
0x11b8   : > { %p2683_p5 = pnand %p2686_p4, %p3048_p9  ;;  %s2161_s20 = scalar_lea.sflag [#allocation3], %s2160_s22 }
0x11ba   : > { %p2684_p6 = pneg %p2683_p5 }
0x11bc   : > { %2872 = dma.done.wait (%p2684_p6), %s2161_s20, 128  }
0x11bd   : > { %2874 = vsyncadd (%p2684_p6), %s2161_s20, 4294967168  ;;  %s27_s20 = sadd.s32 1, %s3497_s27   ;;  %s3500_s29 = sld [smem:[#allocation6_spill]] }
0x11be   : > { %p24_p7 = scmp.ge.s32.totalorder %s27_s20, 6   ;;  %s3501_s30 = sld [smem:[#allocation7_spill]] }
0x11bf   : > { %s3502_s15 = sld [smem:[#allocation17_spill]] }
0x11c0   : > { %s3503_s16 = sld [smem:[#allocation10_spill]]  ;;  %26 = sbr.rel (!%p24_p7) target bundleno = 14 (0xe), region = 154 }
0x11c1   : > { %s3504_s17 = sld [smem:[#allocation11_spill]] }
0x11c2   : > { %s3505_s18 = sld [smem:[#allocation13_spill]] }
0x11c3   : > { %s3506_s19 = sld [smem:[#allocation15_spill]] }
0x11c5   :  { %2166 = vsyncpa [#allocation3], 1 }
0x11c6   :  { %2168 = vsyncpa [#allocation3 + $0x1], 1 }

</bundles_post_ra>
